<compile_context>
chip_gen: v6e
topology: v6e:2x2x1
jax: 0.10.0
libtpu: 0.0.40
codegen_flags: <defaults>
</compile_context>

<pallas_src>
import functools

import jax
import jax.numpy as jnp
from jax import lax
from jax.experimental import pallas as pl
from jax.experimental.pallas import tpu as pltpu

_SUBLANE = 8  # f32 sublane tile


# -----------------------------------------------------------------------------
# Host-side weight preparation for the fused (two-chain) phases.
# PyTorch gate order is [i, f, g, o]; biases are pre-folded (b_ih + b_hh).
# -----------------------------------------------------------------------------
def _pair_slots(w, H, pos):
    """Scatter a (F, 4H) gate-ordered matrix into the fused-pair gate-interleaved
    column layout [i_a, i_b, f_a, f_b, g_a, g_b, o_a, o_b] of shape (F, 8H).
    pos=0 -> chain a columns, pos=1 -> chain b columns (other chain's cols = 0)."""
    F = w.shape[0]
    z = jnp.zeros((F, H), w.dtype)
    cols = []
    for k in range(4):
        blk = w[:, k * H:(k + 1) * H]
        cols.extend([blk, z] if pos == 0 else [z, blk])
    return jnp.concatenate(cols, axis=1)


def prepare_fused_weights(enc_params, dec_params, H, L):
    """Flatten weights into the per-phase list the kernel expects.

    Phase 0          : enc layer 0                 -> (wih, whh, b)        3 refs
    Phase p (1..L-1) : enc_p (a) || dec_{p-1} (b)  -> (wx_a, wx_b, W2, b2) 4 refs
    Phase L          : dec layer L-1               -> (wih, whh, b)        3 refs
    """
    ws = list(enc_params[0])
    for p in range(1, L):
        wih_a, whh_a, b_a = enc_params[p]        # encoder layer p   (chain a)
        wih_b, whh_b, b_b = dec_params[p - 1]    # decoder layer p-1 (chain b)
        wx_a = _pair_slots(wih_a, H, 0)                               # (H,   8H)
        wx_b = _pair_slots(wih_b, H, 1)                               # (I|H, 8H)
        w2 = jnp.concatenate([_pair_slots(whh_a, H, 0),
                              _pair_slots(whh_b, H, 1)], axis=0)      # (2H,  8H)
        b2 = _pair_slots(b_a, H, 0) + _pair_slots(b_b, H, 1)          # (1,   8H)
        ws += [wx_a, wx_b, w2, b2]
    ws += list(dec_params[L - 1])
    return ws


# -----------------------------------------------------------------------------
# Fused kernel: wavefronted encoder + decoder stacks, whole sequence, one call.
# -----------------------------------------------------------------------------
def _make_autoencoder_kernel(T, Bp, H, L):
    f32 = jnp.float32

    def mm(a, b):
        # Pinned single-pass matmul precision (avoid 3x/6x MXU passes on the
        # serial recurrence path).
        return jnp.dot(a, b, precision=lax.Precision.DEFAULT,
                       preferred_element_type=f32)

    def sig(x):
        # sigmoid via one EUP tanh instead of exp + divide.
        return 0.5 * jnp.tanh(0.5 * x) + 0.5

    def single_chain(gx, whh, h, c):
        """One LSTM layer over the whole sequence.  gx: (T*Bp, 4H) hoisted
        input projection (bias folded in).  Returns (h_T, c_T, [h_t])."""
        outs = []
        for t in range(T):                                   # static unroll
            g = gx[t * Bp:(t + 1) * Bp, :] + mm(h, whh)      # (Bp, 4H)
            sg = sig(g)
            th = jnp.tanh(g)
            c = sg[:, H:2 * H] * c + sg[:, 0:H] * th[:, 2 * H:3 * H]
            h = sg[:, 3 * H:4 * H] * jnp.tanh(c)
            outs.append(h)
        return h, c, outs

    def pair_chain(gx2, w2, hc, cc):
        """Two independent LSTM layers (chain a, chain b) advanced in lockstep
        with ONE block-diagonal MXU call per step.  States/gates are held
        concatenated: hc/cc (Bp, 2H) = [a | b]; gates (Bp, 8H) laid out
        [i_a,i_b,f_a,f_b,g_a,g_b,o_a,o_b]."""
        outs_a, outs_b = [], []
        for t in range(T):
            g = gx2[t * Bp:(t + 1) * Bp, :] + mm(hc, w2)     # (Bp, 8H)
            sg = sig(g)
            th = jnp.tanh(g)
            cc = sg[:, 2 * H:4 * H] * cc + sg[:, 0:2 * H] * th[:, 4 * H:6 * H]
            hc = sg[:, 6 * H:8 * H] * jnp.tanh(cc)
            outs_a.append(hc[:, 0:H])
            outs_b.append(hc[:, H:2 * H])
        return hc, cc, outs_a, outs_b

    def kernel(*refs):
        enc_x_ref, dec_x_ref = refs[0], refs[1]
        nw = 4 * L + 2
        w = refs[2:2 + nw]
        emb_ref, dec_out_ref = refs[2 + nw], refs[3 + nw]

        zeros = jnp.zeros((Bp, H), f32)

        # ---------- phase 0: encoder layer 0 (zero initial state) ----------
        gx = mm(enc_x_ref[...], w[0][...]) + w[2][...]         # hoisted x-proj
        h_e, c_e, enc_outs = single_chain(gx, w[1][...], zeros, zeros)
        h_fin, c_fin = [h_e], [c_e]          # encoder final states per layer
        dec_outs = None                      # outputs of decoder layer p-2

        # -------- phases 1..L-1: enc_p fused with dec_{p-1} (wavefront) -----
        for p in range(1, L):
            base = 3 + 4 * (p - 1)
            wx_a, wx_b = w[base][...], w[base + 1][...]
            w2, b2 = w[base + 2][...], w[base + 3][...]
            x_a = jnp.concatenate(enc_outs, axis=0)            # (T*Bp, H)
            x_b = dec_x_ref[...] if p == 1 else jnp.concatenate(dec_outs, axis=0)
            gx2 = mm(x_a, wx_a) + mm(x_b, wx_b) + b2           # (T*Bp, 8H)
            # chain a (enc_p) starts at zero; chain b (dec_{p-1}) starts at
            # encoder layer p-1's final state.
            hc = jnp.concatenate([zeros, h_fin[p - 1]], axis=1)
            cc = jnp.concatenate([zeros, c_fin[p - 1]], axis=1)
            hc, cc, enc_outs, dec_outs = pair_chain(gx2, w2, hc, cc)
            h_fin.append(hc[:, 0:H])
            c_fin.append(cc[:, 0:H])

        # ---------- final phase: decoder layer L-1 ----------
        base = 3 + 4 * (L - 1)
        x_last = dec_x_ref[...] if L == 1 else jnp.concatenate(dec_outs, axis=0)
        gx = mm(x_last, w[base][...]) + w[base + 2][...]
        whh_l = w[base + 1][...]
        h, c = h_fin[L - 1], c_fin[L - 1]
        for t in range(T):
            g = gx[t * Bp:(t + 1) * Bp, :] + mm(h, whh_l)
            sg = sig(g)
            th = jnp.tanh(g)
            c = sg[:, H:2 * H] * c + sg[:, 0:H] * th[:, 2 * H:3 * H]
            h = sg[:, 3 * H:4 * H] * jnp.tanh(c)
            # lane-dense output slab, static lane offset (off the recurrence).
            dec_out_ref[:, t * H:(t + 1) * H] = h

        # ---------- embeddings: one lane-dense (Bp, 2*L*H) store ----------
        emb_ref[...] = jnp.concatenate(h_fin + c_fin, axis=1)

    return kernel


def fused_lstm_autoencoder_pallas(enc_x_2d, dec_x_2d, fused_ws, T, Bp, H, L):
    f32 = jnp.float32
    kernel = _make_autoencoder_kernel(T, Bp, H, L)
    n_in = 2 + len(fused_ws)
    out_shape = (
        jax.ShapeDtypeStruct((Bp, 2 * L * H), f32),   # [h_0..h_{L-1} | c_0..c_{L-1}]
        jax.ShapeDtypeStruct((Bp, T * H), f32),       # decoder sequence, time on lanes
    )
    # No grid: everything (a few hundred KB at most) lives whole in VMEM.
    return pl.pallas_call(
        kernel,
        out_shape=out_shape,
        in_specs=[pl.BlockSpec(memory_space=pltpu.MemorySpace.VMEM)] * n_in,
        out_specs=(pl.BlockSpec(memory_space=pltpu.MemorySpace.VMEM),) * 2,
    )(enc_x_2d, dec_x_2d, *fused_ws)


# -----------------------------------------------------------------------------
# Wrapper reproducing the PyTorch module's forward.
# -----------------------------------------------------------------------------
def prepare_decoder_input(encoder_input, decoder_input):
    last_output = encoder_input[:, -1:, :]
    to_be_used = decoder_input[:, :-1, :]
    return jnp.concatenate((last_output, to_be_used), axis=1)


def lstm_autoencoder_forward(encoder_input, decoder_input,
                             enc_params, dec_params, num_layers, hidden_size):
    B, T, I = encoder_input.shape
    H, L = hidden_size, num_layers
    Bp = ((B + _SUBLANE - 1) // _SUBLANE) * _SUBLANE   # pad batch to a sublane tile

    prepared = prepare_decoder_input(encoder_input, decoder_input)

    def to_time_major(x):           # (B,T,F) -> zero-pad batch -> (T*Bp, F)
        xp = jnp.pad(x, ((0, Bp - B), (0, 0), (0, 0)))
        return jnp.transpose(xp, (1, 0, 2)).reshape(T * Bp, x.shape[-1])

    enc_x_2d = to_time_major(encoder_input)
    dec_x_2d = to_time_major(prepared)

    fused_ws = prepare_fused_weights(enc_params, dec_params, H, L)
    emb_raw, dec_raw = fused_lstm_autoencoder_pallas(
        enc_x_2d, dec_x_2d, fused_ws, T, Bp, H, L)

    # embeddings: kernel layout (B, [h_l0..h_l{L-1} | c_l0..c_l{L-1}]) ->
    # PyTorch hidden.permute(1,2,0).reshape(B,-1) layout (index h*L + l).
    emb_raw = emb_raw[:B]
    hid = emb_raw[:, :L * H].reshape(B, L, H)
    cel = emb_raw[:, L * H:].reshape(B, L, H)
    embeddings = jnp.concatenate(
        (jnp.transpose(hid, (0, 2, 1)).reshape(B, H * L),
         jnp.transpose(cel, (0, 2, 1)).reshape(B, H * L)), axis=1)

    # decoder output (B, T*H) -> (B,T,H); then x.permute(0,2,1).unsqueeze(1).flip(-1).
    dec_seq = dec_raw[:B].reshape(B, T, H)
    x_out = jnp.flip(jnp.transpose(dec_seq, (0, 2, 1))[:, None, :, :], axis=-1)
    return embeddings, x_out


# -----------------------------------------------------------------------------
# Pure-JAX reference (lax.scan) for a correctness check.
# -----------------------------------------------------------------------------
def stacked_lstm_ref(x_btf, params, h0_lbh, c0_lbh):
    x = jnp.transpose(x_btf, (1, 0, 2))
    h_finals, c_finals = [], []
    for layer, (wih_t, whh_t, bias) in enumerate(params):
        H = whh_t.shape[0]

        def step(carry, x_t, wih_t=wih_t, whh_t=whh_t, bias=bias, H=H):
            h, c = carry
            gates = x_t @ wih_t + h @ whh_t + bias
            i = jax.nn.sigmoid(gates[:, 0:H])
            f = jax.nn.sigmoid(gates[:, H:2 * H])
            g = jnp.tanh(gates[:, 2 * H:3 * H])
            o = jax.nn.sigmoid(gates[:, 3 * H:4 * H])
            c_new = f * c + i * g
            h_new = o * jnp.tanh(c_new)
            return (h_new, c_new), h_new

        (hN, cN), out = lax.scan(step, (h0_lbh[layer], c0_lbh[layer]), x)
        h_finals.append(hN)
        c_finals.append(cN)
        x = out
    return jnp.transpose(x, (1, 0, 2)), jnp.stack(h_finals, 0), jnp.stack(c_finals, 0)


# -----------------------------------------------------------------------------
# Deterministic parameter init (PyTorch-style uniform(-1/sqrt(H), 1/sqrt(H))).
# Weights stored pre-transposed as (F_in, 4H), gate order [i,f,g,o]; biases
# pre-folded (b_ih + b_hh) as (1, 4H).
# -----------------------------------------------------------------------------
def init_lstm_params(key, input_size, hidden_size, num_layers):
    params = []
    bound = 1.0 / jnp.sqrt(hidden_size)
    for layer in range(num_layers):
        in_size = input_size if layer == 0 else hidden_size
        key, k1, k2, k3, k4 = jax.random.split(key, 5)
        w_ih = jax.random.uniform(k1, (4 * hidden_size, in_size),
                                  jnp.float32, -bound, bound)
        w_hh = jax.random.uniform(k2, (4 * hidden_size, hidden_size),
                                  jnp.float32, -bound, bound)
        b_ih = jax.random.uniform(k3, (4 * hidden_size,), jnp.float32, -bound, bound)
        b_hh = jax.random.uniform(k4, (4 * hidden_size,), jnp.float32, -bound, bound)
        params.append((w_ih.T, w_hh.T, (b_ih + b_hh)[None, :]))
    return params, key


if __name__ == "__main__":
    # Small shapes consistent with the module: batch_first stacked-LSTM AE.
    B, T, I, H, L = 2, 8, 4, 32, 2
    embedding_size = 2 * H * L   # forced_embedding_size assertion in __init__
    assert embedding_size == 2 * H * L

    key = jax.random.PRNGKey(0)
    key, k_enc_in, k_dec_in = jax.random.split(key, 3)
    encoder_input = jax.random.normal(k_enc_in, (B, T, I), jnp.float32)
    decoder_input = jax.random.normal(k_dec_in, (B, T, I), jnp.float32)

    enc_params, key = init_lstm_params(key, I, H, L)
    dec_params, key = init_lstm_params(key, I, H, L)

    fwd = jax.jit(functools.partial(
        lstm_autoencoder_forward,
        enc_params=enc_params, dec_params=dec_params,
        num_layers=L, hidden_size=H))

    embeddings, x_out = fwd(encoder_input, decoder_input)
    jax.block_until_ready((embeddings, x_out))

    assert embeddings.shape == (B, embedding_size)
    assert x_out.shape == (B, 1, H, T)

    # Cross-check against a pure-JAX lax.scan reference.
    h0 = jnp.zeros((L, B, H), jnp.float32)
    c0 = jnp.zeros((L, B, H), jnp.float32)
    _, h_ref, c_ref = stacked_lstm_ref(encoder_input, enc_params, h0, c0)
    emb_ref = jnp.concatenate(
        (jnp.transpose(h_ref, (1, 2, 0)).reshape(B, -1),
         jnp.transpose(c_ref, (1, 2, 0)).reshape(B, -1)), axis=1)
    prepared = prepare_decoder_input(encoder_input, decoder_input)
    x_ref, _, _ = stacked_lstm_ref(prepared, dec_params, h_ref, c_ref)
    x_ref_out = jnp.flip(jnp.transpose(x_ref, (0, 2, 1))[:, None, :, :], axis=-1)

    assert jnp.allclose(embeddings, emb_ref, atol=2e-3, rtol=2e-3)
    assert jnp.allclose(x_out, x_ref_out, atol=2e-3, rtol=2e-3)

    print("KERNEL_OK")
</pallas_src>

<mosaic_0001>
module attributes {stable_mosaic.version = 11 : i64} {
  func.func @kernel(%arg0: memref<64x4xf32, #tpu.memory_space<vmem>>, %arg1: memref<64x4xf32, #tpu.memory_space<vmem>>, %arg2: memref<4x128xf32, #tpu.memory_space<vmem>>, %arg3: memref<32x128xf32, #tpu.memory_space<vmem>>, %arg4: memref<1x128xf32, #tpu.memory_space<vmem>>, %arg5: memref<32x256xf32, #tpu.memory_space<vmem>>, %arg6: memref<4x256xf32, #tpu.memory_space<vmem>>, %arg7: memref<64x256xf32, #tpu.memory_space<vmem>>, %arg8: memref<1x256xf32, #tpu.memory_space<vmem>>, %arg9: memref<32x128xf32, #tpu.memory_space<vmem>>, %arg10: memref<32x128xf32, #tpu.memory_space<vmem>>, %arg11: memref<1x128xf32, #tpu.memory_space<vmem>>, %arg12: memref<8x128xf32, #tpu.memory_space<vmem>>, %arg13: memref<8x256xf32, #tpu.memory_space<vmem>>) attributes {dimension_semantics = [], scalar_prefetch = 0 : i64, scratch_operands = 0 : i64, tpu.core_type = #tpu.core_type<tc>} {
    %cst = arith.constant 0.000000e+00 : f32
    %0 = vector.broadcast %cst : f32 to vector<8x32xf32>
    %c0 = arith.constant 0 : index
    %c0_0 = arith.constant 0 : index
    %1 = vector.load %arg0[%c0, %c0_0] : memref<64x4xf32, #tpu.memory_space<vmem>>, vector<64x4xf32>
    %c0_1 = arith.constant 0 : index
    %c0_2 = arith.constant 0 : index
    %2 = vector.load %arg2[%c0_1, %c0_2] : memref<4x128xf32, #tpu.memory_space<vmem>>, vector<4x128xf32>
    %cst_3 = arith.constant dense<0.000000e+00> : vector<64x128xf32>
    %3 = tpu.matmul %1, %2, %cst_3 {dimension_numbers = #tpu.dot_dimension_numbers<[1], [0], [0], [1], [0, 0, 1, 1], [], []>} : vector<64x4xf32>, vector<4x128xf32>, vector<64x128xf32> -> vector<64x128xf32>
    %c0_4 = arith.constant 0 : index
    %c0_5 = arith.constant 0 : index
    %4 = vector.load %arg4[%c0_4, %c0_5] : memref<1x128xf32, #tpu.memory_space<vmem>>, vector<1x128xf32>
    %5 = vector.broadcast %4 : vector<1x128xf32> to vector<64x128xf32>
    %6 = arith.addf %3, %5 : vector<64x128xf32>
    %c0_6 = arith.constant 0 : index
    %c0_7 = arith.constant 0 : index
    %7 = vector.load %arg3[%c0_6, %c0_7] : memref<32x128xf32, #tpu.memory_space<vmem>>, vector<32x128xf32>
    %8 = vector.extract_strided_slice %6 {offsets = [0, 0], sizes = [8, 128], strides = [1, 1]} : vector<64x128xf32> to vector<8x128xf32>
    %cst_8 = arith.constant dense<0.000000e+00> : vector<8x128xf32>
    %9 = tpu.matmul %0, %7, %cst_8 {dimension_numbers = #tpu.dot_dimension_numbers<[1], [0], [0], [1], [0, 0, 1, 1], [], []>} : vector<8x32xf32>, vector<32x128xf32>, vector<8x128xf32> -> vector<8x128xf32>
    %10 = arith.addf %8, %9 : vector<8x128xf32>
    %cst_9 = arith.constant 5.000000e-01 : f32
    %11 = vector.broadcast %cst_9 : f32 to vector<8x128xf32>
    %12 = arith.mulf %11, %10 : vector<8x128xf32>
    %13 = math.tanh %12 : vector<8x128xf32>
    %cst_10 = arith.constant 5.000000e-01 : f32
    %14 = vector.broadcast %cst_10 : f32 to vector<8x128xf32>
    %15 = arith.mulf %14, %13 : vector<8x128xf32>
    %cst_11 = arith.constant 5.000000e-01 : f32
    %16 = vector.broadcast %cst_11 : f32 to vector<8x128xf32>
    %17 = arith.addf %15, %16 : vector<8x128xf32>
    %18 = math.tanh %10 : vector<8x128xf32>
    %19 = vector.extract_strided_slice %17 {offsets = [0, 32], sizes = [8, 32], strides = [1, 1]} : vector<8x128xf32> to vector<8x32xf32>
    %20 = arith.mulf %19, %0 : vector<8x32xf32>
    %21 = vector.extract_strided_slice %17 {offsets = [0, 0], sizes = [8, 32], strides = [1, 1]} : vector<8x128xf32> to vector<8x32xf32>
    %22 = vector.extract_strided_slice %18 {offsets = [0, 64], sizes = [8, 32], strides = [1, 1]} : vector<8x128xf32> to vector<8x32xf32>
    %23 = arith.mulf %21, %22 : vector<8x32xf32>
    %24 = arith.addf %20, %23 : vector<8x32xf32>
    %25 = vector.extract_strided_slice %17 {offsets = [0, 96], sizes = [8, 32], strides = [1, 1]} : vector<8x128xf32> to vector<8x32xf32>
    %26 = math.tanh %24 : vector<8x32xf32>
    %27 = arith.mulf %25, %26 : vector<8x32xf32>
    %28 = vector.extract_strided_slice %6 {offsets = [8, 0], sizes = [8, 128], strides = [1, 1]} : vector<64x128xf32> to vector<8x128xf32>
    %cst_12 = arith.constant dense<0.000000e+00> : vector<8x128xf32>
    %29 = tpu.matmul %27, %7, %cst_12 {dimension_numbers = #tpu.dot_dimension_numbers<[1], [0], [0], [1], [0, 0, 1, 1], [], []>} : vector<8x32xf32>, vector<32x128xf32>, vector<8x128xf32> -> vector<8x128xf32>
    %30 = arith.addf %28, %29 : vector<8x128xf32>
    %cst_13 = arith.constant 5.000000e-01 : f32
    %31 = vector.broadcast %cst_13 : f32 to vector<8x128xf32>
    %32 = arith.mulf %31, %30 : vector<8x128xf32>
    %33 = math.tanh %32 : vector<8x128xf32>
    %cst_14 = arith.constant 5.000000e-01 : f32
    %34 = vector.broadcast %cst_14 : f32 to vector<8x128xf32>
    %35 = arith.mulf %34, %33 : vector<8x128xf32>
    %cst_15 = arith.constant 5.000000e-01 : f32
    %36 = vector.broadcast %cst_15 : f32 to vector<8x128xf32>
    %37 = arith.addf %35, %36 : vector<8x128xf32>
    %38 = math.tanh %30 : vector<8x128xf32>
    %39 = vector.extract_strided_slice %37 {offsets = [0, 32], sizes = [8, 32], strides = [1, 1]} : vector<8x128xf32> to vector<8x32xf32>
    %40 = arith.mulf %39, %24 : vector<8x32xf32>
    %41 = vector.extract_strided_slice %37 {offsets = [0, 0], sizes = [8, 32], strides = [1, 1]} : vector<8x128xf32> to vector<8x32xf32>
    %42 = vector.extract_strided_slice %38 {offsets = [0, 64], sizes = [8, 32], strides = [1, 1]} : vector<8x128xf32> to vector<8x32xf32>
    %43 = arith.mulf %41, %42 : vector<8x32xf32>
    %44 = arith.addf %40, %43 : vector<8x32xf32>
    %45 = vector.extract_strided_slice %37 {offsets = [0, 96], sizes = [8, 32], strides = [1, 1]} : vector<8x128xf32> to vector<8x32xf32>
    %46 = math.tanh %44 : vector<8x32xf32>
    %47 = arith.mulf %45, %46 : vector<8x32xf32>
    %48 = vector.extract_strided_slice %6 {offsets = [16, 0], sizes = [8, 128], strides = [1, 1]} : vector<64x128xf32> to vector<8x128xf32>
    %cst_16 = arith.constant dense<0.000000e+00> : vector<8x128xf32>
    %49 = tpu.matmul %47, %7, %cst_16 {dimension_numbers = #tpu.dot_dimension_numbers<[1], [0], [0], [1], [0, 0, 1, 1], [], []>} : vector<8x32xf32>, vector<32x128xf32>, vector<8x128xf32> -> vector<8x128xf32>
    %50 = arith.addf %48, %49 : vector<8x128xf32>
    %cst_17 = arith.constant 5.000000e-01 : f32
    %51 = vector.broadcast %cst_17 : f32 to vector<8x128xf32>
    %52 = arith.mulf %51, %50 : vector<8x128xf32>
    %53 = math.tanh %52 : vector<8x128xf32>
    %cst_18 = arith.constant 5.000000e-01 : f32
    %54 = vector.broadcast %cst_18 : f32 to vector<8x128xf32>
    %55 = arith.mulf %54, %53 : vector<8x128xf32>
    %cst_19 = arith.constant 5.000000e-01 : f32
    %56 = vector.broadcast %cst_19 : f32 to vector<8x128xf32>
    %57 = arith.addf %55, %56 : vector<8x128xf32>
    %58 = math.tanh %50 : vector<8x128xf32>
    %59 = vector.extract_strided_slice %57 {offsets = [0, 32], sizes = [8, 32], strides = [1, 1]} : vector<8x128xf32> to vector<8x32xf32>
    %60 = arith.mulf %59, %44 : vector<8x32xf32>
    %61 = vector.extract_strided_slice %57 {offsets = [0, 0], sizes = [8, 32], strides = [1, 1]} : vector<8x128xf32> to vector<8x32xf32>
    %62 = vector.extract_strided_slice %58 {offsets = [0, 64], sizes = [8, 32], strides = [1, 1]} : vector<8x128xf32> to vector<8x32xf32>
    %63 = arith.mulf %61, %62 : vector<8x32xf32>
    %64 = arith.addf %60, %63 : vector<8x32xf32>
    %65 = vector.extract_strided_slice %57 {offsets = [0, 96], sizes = [8, 32], strides = [1, 1]} : vector<8x128xf32> to vector<8x32xf32>
    %66 = math.tanh %64 : vector<8x32xf32>
    %67 = arith.mulf %65, %66 : vector<8x32xf32>
    %68 = vector.extract_strided_slice %6 {offsets = [24, 0], sizes = [8, 128], strides = [1, 1]} : vector<64x128xf32> to vector<8x128xf32>
    %cst_20 = arith.constant dense<0.000000e+00> : vector<8x128xf32>
    %69 = tpu.matmul %67, %7, %cst_20 {dimension_numbers = #tpu.dot_dimension_numbers<[1], [0], [0], [1], [0, 0, 1, 1], [], []>} : vector<8x32xf32>, vector<32x128xf32>, vector<8x128xf32> -> vector<8x128xf32>
    %70 = arith.addf %68, %69 : vector<8x128xf32>
    %cst_21 = arith.constant 5.000000e-01 : f32
    %71 = vector.broadcast %cst_21 : f32 to vector<8x128xf32>
    %72 = arith.mulf %71, %70 : vector<8x128xf32>
    %73 = math.tanh %72 : vector<8x128xf32>
    %cst_22 = arith.constant 5.000000e-01 : f32
    %74 = vector.broadcast %cst_22 : f32 to vector<8x128xf32>
    %75 = arith.mulf %74, %73 : vector<8x128xf32>
    %cst_23 = arith.constant 5.000000e-01 : f32
    %76 = vector.broadcast %cst_23 : f32 to vector<8x128xf32>
    %77 = arith.addf %75, %76 : vector<8x128xf32>
    %78 = math.tanh %70 : vector<8x128xf32>
    %79 = vector.extract_strided_slice %77 {offsets = [0, 32], sizes = [8, 32], strides = [1, 1]} : vector<8x128xf32> to vector<8x32xf32>
    %80 = arith.mulf %79, %64 : vector<8x32xf32>
    %81 = vector.extract_strided_slice %77 {offsets = [0, 0], sizes = [8, 32], strides = [1, 1]} : vector<8x128xf32> to vector<8x32xf32>
    %82 = vector.extract_strided_slice %78 {offsets = [0, 64], sizes = [8, 32], strides = [1, 1]} : vector<8x128xf32> to vector<8x32xf32>
    %83 = arith.mulf %81, %82 : vector<8x32xf32>
    %84 = arith.addf %80, %83 : vector<8x32xf32>
    %85 = vector.extract_strided_slice %77 {offsets = [0, 96], sizes = [8, 32], strides = [1, 1]} : vector<8x128xf32> to vector<8x32xf32>
    %86 = math.tanh %84 : vector<8x32xf32>
    %87 = arith.mulf %85, %86 : vector<8x32xf32>
    %88 = vector.extract_strided_slice %6 {offsets = [32, 0], sizes = [8, 128], strides = [1, 1]} : vector<64x128xf32> to vector<8x128xf32>
    %cst_24 = arith.constant dense<0.000000e+00> : vector<8x128xf32>
    %89 = tpu.matmul %87, %7, %cst_24 {dimension_numbers = #tpu.dot_dimension_numbers<[1], [0], [0], [1], [0, 0, 1, 1], [], []>} : vector<8x32xf32>, vector<32x128xf32>, vector<8x128xf32> -> vector<8x128xf32>
    %90 = arith.addf %88, %89 : vector<8x128xf32>
    %cst_25 = arith.constant 5.000000e-01 : f32
    %91 = vector.broadcast %cst_25 : f32 to vector<8x128xf32>
    %92 = arith.mulf %91, %90 : vector<8x128xf32>
    %93 = math.tanh %92 : vector<8x128xf32>
    %cst_26 = arith.constant 5.000000e-01 : f32
    %94 = vector.broadcast %cst_26 : f32 to vector<8x128xf32>
    %95 = arith.mulf %94, %93 : vector<8x128xf32>
    %cst_27 = arith.constant 5.000000e-01 : f32
    %96 = vector.broadcast %cst_27 : f32 to vector<8x128xf32>
    %97 = arith.addf %95, %96 : vector<8x128xf32>
    %98 = math.tanh %90 : vector<8x128xf32>
    %99 = vector.extract_strided_slice %97 {offsets = [0, 32], sizes = [8, 32], strides = [1, 1]} : vector<8x128xf32> to vector<8x32xf32>
    %100 = arith.mulf %99, %84 : vector<8x32xf32>
    %101 = vector.extract_strided_slice %97 {offsets = [0, 0], sizes = [8, 32], strides = [1, 1]} : vector<8x128xf32> to vector<8x32xf32>
    %102 = vector.extract_strided_slice %98 {offsets = [0, 64], sizes = [8, 32], strides = [1, 1]} : vector<8x128xf32> to vector<8x32xf32>
    %103 = arith.mulf %101, %102 : vector<8x32xf32>
    %104 = arith.addf %100, %103 : vector<8x32xf32>
    %105 = vector.extract_strided_slice %97 {offsets = [0, 96], sizes = [8, 32], strides = [1, 1]} : vector<8x128xf32> to vector<8x32xf32>
    %106 = math.tanh %104 : vector<8x32xf32>
    %107 = arith.mulf %105, %106 : vector<8x32xf32>
    %108 = vector.extract_strided_slice %6 {offsets = [40, 0], sizes = [8, 128], strides = [1, 1]} : vector<64x128xf32> to vector<8x128xf32>
    %cst_28 = arith.constant dense<0.000000e+00> : vector<8x128xf32>
    %109 = tpu.matmul %107, %7, %cst_28 {dimension_numbers = #tpu.dot_dimension_numbers<[1], [0], [0], [1], [0, 0, 1, 1], [], []>} : vector<8x32xf32>, vector<32x128xf32>, vector<8x128xf32> -> vector<8x128xf32>
    %110 = arith.addf %108, %109 : vector<8x128xf32>
    %cst_29 = arith.constant 5.000000e-01 : f32
    %111 = vector.broadcast %cst_29 : f32 to vector<8x128xf32>
    %112 = arith.mulf %111, %110 : vector<8x128xf32>
    %113 = math.tanh %112 : vector<8x128xf32>
    %cst_30 = arith.constant 5.000000e-01 : f32
    %114 = vector.broadcast %cst_30 : f32 to vector<8x128xf32>
    %115 = arith.mulf %114, %113 : vector<8x128xf32>
    %cst_31 = arith.constant 5.000000e-01 : f32
    %116 = vector.broadcast %cst_31 : f32 to vector<8x128xf32>
    %117 = arith.addf %115, %116 : vector<8x128xf32>
    %118 = math.tanh %110 : vector<8x128xf32>
    %119 = vector.extract_strided_slice %117 {offsets = [0, 32], sizes = [8, 32], strides = [1, 1]} : vector<8x128xf32> to vector<8x32xf32>
    %120 = arith.mulf %119, %104 : vector<8x32xf32>
    %121 = vector.extract_strided_slice %117 {offsets = [0, 0], sizes = [8, 32], strides = [1, 1]} : vector<8x128xf32> to vector<8x32xf32>
    %122 = vector.extract_strided_slice %118 {offsets = [0, 64], sizes = [8, 32], strides = [1, 1]} : vector<8x128xf32> to vector<8x32xf32>
    %123 = arith.mulf %121, %122 : vector<8x32xf32>
    %124 = arith.addf %120, %123 : vector<8x32xf32>
    %125 = vector.extract_strided_slice %117 {offsets = [0, 96], sizes = [8, 32], strides = [1, 1]} : vector<8x128xf32> to vector<8x32xf32>
    %126 = math.tanh %124 : vector<8x32xf32>
    %127 = arith.mulf %125, %126 : vector<8x32xf32>
    %128 = vector.extract_strided_slice %6 {offsets = [48, 0], sizes = [8, 128], strides = [1, 1]} : vector<64x128xf32> to vector<8x128xf32>
    %cst_32 = arith.constant dense<0.000000e+00> : vector<8x128xf32>
    %129 = tpu.matmul %127, %7, %cst_32 {dimension_numbers = #tpu.dot_dimension_numbers<[1], [0], [0], [1], [0, 0, 1, 1], [], []>} : vector<8x32xf32>, vector<32x128xf32>, vector<8x128xf32> -> vector<8x128xf32>
    %130 = arith.addf %128, %129 : vector<8x128xf32>
    %cst_33 = arith.constant 5.000000e-01 : f32
    %131 = vector.broadcast %cst_33 : f32 to vector<8x128xf32>
    %132 = arith.mulf %131, %130 : vector<8x128xf32>
    %133 = math.tanh %132 : vector<8x128xf32>
    %cst_34 = arith.constant 5.000000e-01 : f32
    %134 = vector.broadcast %cst_34 : f32 to vector<8x128xf32>
    %135 = arith.mulf %134, %133 : vector<8x128xf32>
    %cst_35 = arith.constant 5.000000e-01 : f32
    %136 = vector.broadcast %cst_35 : f32 to vector<8x128xf32>
    %137 = arith.addf %135, %136 : vector<8x128xf32>
    %138 = math.tanh %130 : vector<8x128xf32>
    %139 = vector.extract_strided_slice %137 {offsets = [0, 32], sizes = [8, 32], strides = [1, 1]} : vector<8x128xf32> to vector<8x32xf32>
    %140 = arith.mulf %139, %124 : vector<8x32xf32>
    %141 = vector.extract_strided_slice %137 {offsets = [0, 0], sizes = [8, 32], strides = [1, 1]} : vector<8x128xf32> to vector<8x32xf32>
    %142 = vector.extract_strided_slice %138 {offsets = [0, 64], sizes = [8, 32], strides = [1, 1]} : vector<8x128xf32> to vector<8x32xf32>
    %143 = arith.mulf %141, %142 : vector<8x32xf32>
    %144 = arith.addf %140, %143 : vector<8x32xf32>
    %145 = vector.extract_strided_slice %137 {offsets = [0, 96], sizes = [8, 32], strides = [1, 1]} : vector<8x128xf32> to vector<8x32xf32>
    %146 = math.tanh %144 : vector<8x32xf32>
    %147 = arith.mulf %145, %146 : vector<8x32xf32>
    %148 = vector.extract_strided_slice %6 {offsets = [56, 0], sizes = [8, 128], strides = [1, 1]} : vector<64x128xf32> to vector<8x128xf32>
    %cst_36 = arith.constant dense<0.000000e+00> : vector<8x128xf32>
    %149 = tpu.matmul %147, %7, %cst_36 {dimension_numbers = #tpu.dot_dimension_numbers<[1], [0], [0], [1], [0, 0, 1, 1], [], []>} : vector<8x32xf32>, vector<32x128xf32>, vector<8x128xf32> -> vector<8x128xf32>
    %150 = arith.addf %148, %149 : vector<8x128xf32>
    %cst_37 = arith.constant 5.000000e-01 : f32
    %151 = vector.broadcast %cst_37 : f32 to vector<8x128xf32>
    %152 = arith.mulf %151, %150 : vector<8x128xf32>
    %153 = math.tanh %152 : vector<8x128xf32>
    %cst_38 = arith.constant 5.000000e-01 : f32
    %154 = vector.broadcast %cst_38 : f32 to vector<8x128xf32>
    %155 = arith.mulf %154, %153 : vector<8x128xf32>
    %cst_39 = arith.constant 5.000000e-01 : f32
    %156 = vector.broadcast %cst_39 : f32 to vector<8x128xf32>
    %157 = arith.addf %155, %156 : vector<8x128xf32>
    %158 = math.tanh %150 : vector<8x128xf32>
    %159 = vector.extract_strided_slice %157 {offsets = [0, 32], sizes = [8, 32], strides = [1, 1]} : vector<8x128xf32> to vector<8x32xf32>
    %160 = arith.mulf %159, %144 : vector<8x32xf32>
    %161 = vector.extract_strided_slice %157 {offsets = [0, 0], sizes = [8, 32], strides = [1, 1]} : vector<8x128xf32> to vector<8x32xf32>
    %162 = vector.extract_strided_slice %158 {offsets = [0, 64], sizes = [8, 32], strides = [1, 1]} : vector<8x128xf32> to vector<8x32xf32>
    %163 = arith.mulf %161, %162 : vector<8x32xf32>
    %164 = arith.addf %160, %163 : vector<8x32xf32>
    %165 = vector.extract_strided_slice %157 {offsets = [0, 96], sizes = [8, 32], strides = [1, 1]} : vector<8x128xf32> to vector<8x32xf32>
    %166 = math.tanh %164 : vector<8x32xf32>
    %167 = arith.mulf %165, %166 : vector<8x32xf32>
    %c0_40 = arith.constant 0 : index
    %c0_41 = arith.constant 0 : index
    %168 = vector.load %arg5[%c0_40, %c0_41] : memref<32x256xf32, #tpu.memory_space<vmem>>, vector<32x256xf32>
    %c0_42 = arith.constant 0 : index
    %c0_43 = arith.constant 0 : index
    %169 = vector.load %arg6[%c0_42, %c0_43] : memref<4x256xf32, #tpu.memory_space<vmem>>, vector<4x256xf32>
    %c0_44 = arith.constant 0 : index
    %c0_45 = arith.constant 0 : index
    %170 = vector.load %arg7[%c0_44, %c0_45] : memref<64x256xf32, #tpu.memory_space<vmem>>, vector<64x256xf32>
    %c0_46 = arith.constant 0 : index
    %c0_47 = arith.constant 0 : index
    %171 = vector.load %arg8[%c0_46, %c0_47] : memref<1x256xf32, #tpu.memory_space<vmem>>, vector<1x256xf32>
    %172 = tpu.concatenate %27, %47, %67, %87, %107, %127, %147, %167 in 0 : vector<8x32xf32>, vector<8x32xf32>, vector<8x32xf32>, vector<8x32xf32>, vector<8x32xf32>, vector<8x32xf32>, vector<8x32xf32>, vector<8x32xf32> -> vector<64x32xf32>
    %c0_48 = arith.constant 0 : index
    %c0_49 = arith.constant 0 : index
    %173 = vector.load %arg1[%c0_48, %c0_49] : memref<64x4xf32, #tpu.memory_space<vmem>>, vector<64x4xf32>
    %cst_50 = arith.constant dense<0.000000e+00> : vector<64x256xf32>
    %174 = tpu.matmul %172, %168, %cst_50 {dimension_numbers = #tpu.dot_dimension_numbers<[1], [0], [0], [1], [0, 0, 1, 1], [], []>} : vector<64x32xf32>, vector<32x256xf32>, vector<64x256xf32> -> vector<64x256xf32>
    %cst_51 = arith.constant dense<0.000000e+00> : vector<64x256xf32>
    %175 = tpu.matmul %173, %169, %cst_51 {dimension_numbers = #tpu.dot_dimension_numbers<[1], [0], [0], [1], [0, 0, 1, 1], [], []>} : vector<64x4xf32>, vector<4x256xf32>, vector<64x256xf32> -> vector<64x256xf32>
    %176 = arith.addf %174, %175 : vector<64x256xf32>
    %177 = vector.broadcast %171 : vector<1x256xf32> to vector<64x256xf32>
    %178 = arith.addf %176, %177 : vector<64x256xf32>
    %179 = tpu.concatenate %0, %167 in 1 : vector<8x32xf32>, vector<8x32xf32> -> vector<8x64xf32>
    %180 = tpu.concatenate %0, %164 in 1 : vector<8x32xf32>, vector<8x32xf32> -> vector<8x64xf32>
    %181 = vector.extract_strided_slice %178 {offsets = [0, 0], sizes = [8, 256], strides = [1, 1]} : vector<64x256xf32> to vector<8x256xf32>
    %cst_52 = arith.constant dense<0.000000e+00> : vector<8x256xf32>
    %182 = tpu.matmul %179, %170, %cst_52 {dimension_numbers = #tpu.dot_dimension_numbers<[1], [0], [0], [1], [0, 0, 1, 1], [], []>} : vector<8x64xf32>, vector<64x256xf32>, vector<8x256xf32> -> vector<8x256xf32>
    %183 = arith.addf %181, %182 : vector<8x256xf32>
    %cst_53 = arith.constant 5.000000e-01 : f32
    %184 = vector.broadcast %cst_53 : f32 to vector<8x256xf32>
    %185 = arith.mulf %184, %183 : vector<8x256xf32>
    %186 = math.tanh %185 : vector<8x256xf32>
    %cst_54 = arith.constant 5.000000e-01 : f32
    %187 = vector.broadcast %cst_54 : f32 to vector<8x256xf32>
    %188 = arith.mulf %187, %186 : vector<8x256xf32>
    %cst_55 = arith.constant 5.000000e-01 : f32
    %189 = vector.broadcast %cst_55 : f32 to vector<8x256xf32>
    %190 = arith.addf %188, %189 : vector<8x256xf32>
    %191 = math.tanh %183 : vector<8x256xf32>
    %192 = vector.extract_strided_slice %190 {offsets = [0, 64], sizes = [8, 64], strides = [1, 1]} : vector<8x256xf32> to vector<8x64xf32>
    %193 = arith.mulf %192, %180 : vector<8x64xf32>
    %194 = vector.extract_strided_slice %190 {offsets = [0, 0], sizes = [8, 64], strides = [1, 1]} : vector<8x256xf32> to vector<8x64xf32>
    %195 = vector.extract_strided_slice %191 {offsets = [0, 128], sizes = [8, 64], strides = [1, 1]} : vector<8x256xf32> to vector<8x64xf32>
    %196 = arith.mulf %194, %195 : vector<8x64xf32>
    %197 = arith.addf %193, %196 : vector<8x64xf32>
    %198 = vector.extract_strided_slice %190 {offsets = [0, 192], sizes = [8, 64], strides = [1, 1]} : vector<8x256xf32> to vector<8x64xf32>
    %199 = math.tanh %197 : vector<8x64xf32>
    %200 = arith.mulf %198, %199 : vector<8x64xf32>
    %201 = vector.extract_strided_slice %200 {offsets = [0, 32], sizes = [8, 32], strides = [1, 1]} : vector<8x64xf32> to vector<8x32xf32>
    %202 = vector.extract_strided_slice %178 {offsets = [8, 0], sizes = [8, 256], strides = [1, 1]} : vector<64x256xf32> to vector<8x256xf32>
    %cst_56 = arith.constant dense<0.000000e+00> : vector<8x256xf32>
    %203 = tpu.matmul %200, %170, %cst_56 {dimension_numbers = #tpu.dot_dimension_numbers<[1], [0], [0], [1], [0, 0, 1, 1], [], []>} : vector<8x64xf32>, vector<64x256xf32>, vector<8x256xf32> -> vector<8x256xf32>
    %204 = arith.addf %202, %203 : vector<8x256xf32>
    %cst_57 = arith.constant 5.000000e-01 : f32
    %205 = vector.broadcast %cst_57 : f32 to vector<8x256xf32>
    %206 = arith.mulf %205, %204 : vector<8x256xf32>
    %207 = math.tanh %206 : vector<8x256xf32>
    %cst_58 = arith.constant 5.000000e-01 : f32
    %208 = vector.broadcast %cst_58 : f32 to vector<8x256xf32>
    %209 = arith.mulf %208, %207 : vector<8x256xf32>
    %cst_59 = arith.constant 5.000000e-01 : f32
    %210 = vector.broadcast %cst_59 : f32 to vector<8x256xf32>
    %211 = arith.addf %209, %210 : vector<8x256xf32>
    %212 = math.tanh %204 : vector<8x256xf32>
    %213 = vector.extract_strided_slice %211 {offsets = [0, 64], sizes = [8, 64], strides = [1, 1]} : vector<8x256xf32> to vector<8x64xf32>
    %214 = arith.mulf %213, %197 : vector<8x64xf32>
    %215 = vector.extract_strided_slice %211 {offsets = [0, 0], sizes = [8, 64], strides = [1, 1]} : vector<8x256xf32> to vector<8x64xf32>
    %216 = vector.extract_strided_slice %212 {offsets = [0, 128], sizes = [8, 64], strides = [1, 1]} : vector<8x256xf32> to vector<8x64xf32>
    %217 = arith.mulf %215, %216 : vector<8x64xf32>
    %218 = arith.addf %214, %217 : vector<8x64xf32>
    %219 = vector.extract_strided_slice %211 {offsets = [0, 192], sizes = [8, 64], strides = [1, 1]} : vector<8x256xf32> to vector<8x64xf32>
    %220 = math.tanh %218 : vector<8x64xf32>
    %221 = arith.mulf %219, %220 : vector<8x64xf32>
    %222 = vector.extract_strided_slice %221 {offsets = [0, 32], sizes = [8, 32], strides = [1, 1]} : vector<8x64xf32> to vector<8x32xf32>
    %223 = vector.extract_strided_slice %178 {offsets = [16, 0], sizes = [8, 256], strides = [1, 1]} : vector<64x256xf32> to vector<8x256xf32>
    %cst_60 = arith.constant dense<0.000000e+00> : vector<8x256xf32>
    %224 = tpu.matmul %221, %170, %cst_60 {dimension_numbers = #tpu.dot_dimension_numbers<[1], [0], [0], [1], [0, 0, 1, 1], [], []>} : vector<8x64xf32>, vector<64x256xf32>, vector<8x256xf32> -> vector<8x256xf32>
    %225 = arith.addf %223, %224 : vector<8x256xf32>
    %cst_61 = arith.constant 5.000000e-01 : f32
    %226 = vector.broadcast %cst_61 : f32 to vector<8x256xf32>
    %227 = arith.mulf %226, %225 : vector<8x256xf32>
    %228 = math.tanh %227 : vector<8x256xf32>
    %cst_62 = arith.constant 5.000000e-01 : f32
    %229 = vector.broadcast %cst_62 : f32 to vector<8x256xf32>
    %230 = arith.mulf %229, %228 : vector<8x256xf32>
    %cst_63 = arith.constant 5.000000e-01 : f32
    %231 = vector.broadcast %cst_63 : f32 to vector<8x256xf32>
    %232 = arith.addf %230, %231 : vector<8x256xf32>
    %233 = math.tanh %225 : vector<8x256xf32>
    %234 = vector.extract_strided_slice %232 {offsets = [0, 64], sizes = [8, 64], strides = [1, 1]} : vector<8x256xf32> to vector<8x64xf32>
    %235 = arith.mulf %234, %218 : vector<8x64xf32>
    %236 = vector.extract_strided_slice %232 {offsets = [0, 0], sizes = [8, 64], strides = [1, 1]} : vector<8x256xf32> to vector<8x64xf32>
    %237 = vector.extract_strided_slice %233 {offsets = [0, 128], sizes = [8, 64], strides = [1, 1]} : vector<8x256xf32> to vector<8x64xf32>
    %238 = arith.mulf %236, %237 : vector<8x64xf32>
    %239 = arith.addf %235, %238 : vector<8x64xf32>
    %240 = vector.extract_strided_slice %232 {offsets = [0, 192], sizes = [8, 64], strides = [1, 1]} : vector<8x256xf32> to vector<8x64xf32>
    %241 = math.tanh %239 : vector<8x64xf32>
    %242 = arith.mulf %240, %241 : vector<8x64xf32>
    %243 = vector.extract_strided_slice %242 {offsets = [0, 32], sizes = [8, 32], strides = [1, 1]} : vector<8x64xf32> to vector<8x32xf32>
    %244 = vector.extract_strided_slice %178 {offsets = [24, 0], sizes = [8, 256], strides = [1, 1]} : vector<64x256xf32> to vector<8x256xf32>
    %cst_64 = arith.constant dense<0.000000e+00> : vector<8x256xf32>
    %245 = tpu.matmul %242, %170, %cst_64 {dimension_numbers = #tpu.dot_dimension_numbers<[1], [0], [0], [1], [0, 0, 1, 1], [], []>} : vector<8x64xf32>, vector<64x256xf32>, vector<8x256xf32> -> vector<8x256xf32>
    %246 = arith.addf %244, %245 : vector<8x256xf32>
    %cst_65 = arith.constant 5.000000e-01 : f32
    %247 = vector.broadcast %cst_65 : f32 to vector<8x256xf32>
    %248 = arith.mulf %247, %246 : vector<8x256xf32>
    %249 = math.tanh %248 : vector<8x256xf32>
    %cst_66 = arith.constant 5.000000e-01 : f32
    %250 = vector.broadcast %cst_66 : f32 to vector<8x256xf32>
    %251 = arith.mulf %250, %249 : vector<8x256xf32>
    %cst_67 = arith.constant 5.000000e-01 : f32
    %252 = vector.broadcast %cst_67 : f32 to vector<8x256xf32>
    %253 = arith.addf %251, %252 : vector<8x256xf32>
    %254 = math.tanh %246 : vector<8x256xf32>
    %255 = vector.extract_strided_slice %253 {offsets = [0, 64], sizes = [8, 64], strides = [1, 1]} : vector<8x256xf32> to vector<8x64xf32>
    %256 = arith.mulf %255, %239 : vector<8x64xf32>
    %257 = vector.extract_strided_slice %253 {offsets = [0, 0], sizes = [8, 64], strides = [1, 1]} : vector<8x256xf32> to vector<8x64xf32>
    %258 = vector.extract_strided_slice %254 {offsets = [0, 128], sizes = [8, 64], strides = [1, 1]} : vector<8x256xf32> to vector<8x64xf32>
    %259 = arith.mulf %257, %258 : vector<8x64xf32>
    %260 = arith.addf %256, %259 : vector<8x64xf32>
    %261 = vector.extract_strided_slice %253 {offsets = [0, 192], sizes = [8, 64], strides = [1, 1]} : vector<8x256xf32> to vector<8x64xf32>
    %262 = math.tanh %260 : vector<8x64xf32>
    %263 = arith.mulf %261, %262 : vector<8x64xf32>
    %264 = vector.extract_strided_slice %263 {offsets = [0, 32], sizes = [8, 32], strides = [1, 1]} : vector<8x64xf32> to vector<8x32xf32>
    %265 = vector.extract_strided_slice %178 {offsets = [32, 0], sizes = [8, 256], strides = [1, 1]} : vector<64x256xf32> to vector<8x256xf32>
    %cst_68 = arith.constant dense<0.000000e+00> : vector<8x256xf32>
    %266 = tpu.matmul %263, %170, %cst_68 {dimension_numbers = #tpu.dot_dimension_numbers<[1], [0], [0], [1], [0, 0, 1, 1], [], []>} : vector<8x64xf32>, vector<64x256xf32>, vector<8x256xf32> -> vector<8x256xf32>
    %267 = arith.addf %265, %266 : vector<8x256xf32>
    %cst_69 = arith.constant 5.000000e-01 : f32
    %268 = vector.broadcast %cst_69 : f32 to vector<8x256xf32>
    %269 = arith.mulf %268, %267 : vector<8x256xf32>
    %270 = math.tanh %269 : vector<8x256xf32>
    %cst_70 = arith.constant 5.000000e-01 : f32
    %271 = vector.broadcast %cst_70 : f32 to vector<8x256xf32>
    %272 = arith.mulf %271, %270 : vector<8x256xf32>
    %cst_71 = arith.constant 5.000000e-01 : f32
    %273 = vector.broadcast %cst_71 : f32 to vector<8x256xf32>
    %274 = arith.addf %272, %273 : vector<8x256xf32>
    %275 = math.tanh %267 : vector<8x256xf32>
    %276 = vector.extract_strided_slice %274 {offsets = [0, 64], sizes = [8, 64], strides = [1, 1]} : vector<8x256xf32> to vector<8x64xf32>
    %277 = arith.mulf %276, %260 : vector<8x64xf32>
    %278 = vector.extract_strided_slice %274 {offsets = [0, 0], sizes = [8, 64], strides = [1, 1]} : vector<8x256xf32> to vector<8x64xf32>
    %279 = vector.extract_strided_slice %275 {offsets = [0, 128], sizes = [8, 64], strides = [1, 1]} : vector<8x256xf32> to vector<8x64xf32>
    %280 = arith.mulf %278, %279 : vector<8x64xf32>
    %281 = arith.addf %277, %280 : vector<8x64xf32>
    %282 = vector.extract_strided_slice %274 {offsets = [0, 192], sizes = [8, 64], strides = [1, 1]} : vector<8x256xf32> to vector<8x64xf32>
    %283 = math.tanh %281 : vector<8x64xf32>
    %284 = arith.mulf %282, %283 : vector<8x64xf32>
    %285 = vector.extract_strided_slice %284 {offsets = [0, 32], sizes = [8, 32], strides = [1, 1]} : vector<8x64xf32> to vector<8x32xf32>
    %286 = vector.extract_strided_slice %178 {offsets = [40, 0], sizes = [8, 256], strides = [1, 1]} : vector<64x256xf32> to vector<8x256xf32>
    %cst_72 = arith.constant dense<0.000000e+00> : vector<8x256xf32>
    %287 = tpu.matmul %284, %170, %cst_72 {dimension_numbers = #tpu.dot_dimension_numbers<[1], [0], [0], [1], [0, 0, 1, 1], [], []>} : vector<8x64xf32>, vector<64x256xf32>, vector<8x256xf32> -> vector<8x256xf32>
    %288 = arith.addf %286, %287 : vector<8x256xf32>
    %cst_73 = arith.constant 5.000000e-01 : f32
    %289 = vector.broadcast %cst_73 : f32 to vector<8x256xf32>
    %290 = arith.mulf %289, %288 : vector<8x256xf32>
    %291 = math.tanh %290 : vector<8x256xf32>
    %cst_74 = arith.constant 5.000000e-01 : f32
    %292 = vector.broadcast %cst_74 : f32 to vector<8x256xf32>
    %293 = arith.mulf %292, %291 : vector<8x256xf32>
    %cst_75 = arith.constant 5.000000e-01 : f32
    %294 = vector.broadcast %cst_75 : f32 to vector<8x256xf32>
    %295 = arith.addf %293, %294 : vector<8x256xf32>
    %296 = math.tanh %288 : vector<8x256xf32>
    %297 = vector.extract_strided_slice %295 {offsets = [0, 64], sizes = [8, 64], strides = [1, 1]} : vector<8x256xf32> to vector<8x64xf32>
    %298 = arith.mulf %297, %281 : vector<8x64xf32>
    %299 = vector.extract_strided_slice %295 {offsets = [0, 0], sizes = [8, 64], strides = [1, 1]} : vector<8x256xf32> to vector<8x64xf32>
    %300 = vector.extract_strided_slice %296 {offsets = [0, 128], sizes = [8, 64], strides = [1, 1]} : vector<8x256xf32> to vector<8x64xf32>
    %301 = arith.mulf %299, %300 : vector<8x64xf32>
    %302 = arith.addf %298, %301 : vector<8x64xf32>
    %303 = vector.extract_strided_slice %295 {offsets = [0, 192], sizes = [8, 64], strides = [1, 1]} : vector<8x256xf32> to vector<8x64xf32>
    %304 = math.tanh %302 : vector<8x64xf32>
    %305 = arith.mulf %303, %304 : vector<8x64xf32>
    %306 = vector.extract_strided_slice %305 {offsets = [0, 32], sizes = [8, 32], strides = [1, 1]} : vector<8x64xf32> to vector<8x32xf32>
    %307 = vector.extract_strided_slice %178 {offsets = [48, 0], sizes = [8, 256], strides = [1, 1]} : vector<64x256xf32> to vector<8x256xf32>
    %cst_76 = arith.constant dense<0.000000e+00> : vector<8x256xf32>
    %308 = tpu.matmul %305, %170, %cst_76 {dimension_numbers = #tpu.dot_dimension_numbers<[1], [0], [0], [1], [0, 0, 1, 1], [], []>} : vector<8x64xf32>, vector<64x256xf32>, vector<8x256xf32> -> vector<8x256xf32>
    %309 = arith.addf %307, %308 : vector<8x256xf32>
    %cst_77 = arith.constant 5.000000e-01 : f32
    %310 = vector.broadcast %cst_77 : f32 to vector<8x256xf32>
    %311 = arith.mulf %310, %309 : vector<8x256xf32>
    %312 = math.tanh %311 : vector<8x256xf32>
    %cst_78 = arith.constant 5.000000e-01 : f32
    %313 = vector.broadcast %cst_78 : f32 to vector<8x256xf32>
    %314 = arith.mulf %313, %312 : vector<8x256xf32>
    %cst_79 = arith.constant 5.000000e-01 : f32
    %315 = vector.broadcast %cst_79 : f32 to vector<8x256xf32>
    %316 = arith.addf %314, %315 : vector<8x256xf32>
    %317 = math.tanh %309 : vector<8x256xf32>
    %318 = vector.extract_strided_slice %316 {offsets = [0, 64], sizes = [8, 64], strides = [1, 1]} : vector<8x256xf32> to vector<8x64xf32>
    %319 = arith.mulf %318, %302 : vector<8x64xf32>
    %320 = vector.extract_strided_slice %316 {offsets = [0, 0], sizes = [8, 64], strides = [1, 1]} : vector<8x256xf32> to vector<8x64xf32>
    %321 = vector.extract_strided_slice %317 {offsets = [0, 128], sizes = [8, 64], strides = [1, 1]} : vector<8x256xf32> to vector<8x64xf32>
    %322 = arith.mulf %320, %321 : vector<8x64xf32>
    %323 = arith.addf %319, %322 : vector<8x64xf32>
    %324 = vector.extract_strided_slice %316 {offsets = [0, 192], sizes = [8, 64], strides = [1, 1]} : vector<8x256xf32> to vector<8x64xf32>
    %325 = math.tanh %323 : vector<8x64xf32>
    %326 = arith.mulf %324, %325 : vector<8x64xf32>
    %327 = vector.extract_strided_slice %326 {offsets = [0, 32], sizes = [8, 32], strides = [1, 1]} : vector<8x64xf32> to vector<8x32xf32>
    %328 = vector.extract_strided_slice %178 {offsets = [56, 0], sizes = [8, 256], strides = [1, 1]} : vector<64x256xf32> to vector<8x256xf32>
    %cst_80 = arith.constant dense<0.000000e+00> : vector<8x256xf32>
    %329 = tpu.matmul %326, %170, %cst_80 {dimension_numbers = #tpu.dot_dimension_numbers<[1], [0], [0], [1], [0, 0, 1, 1], [], []>} : vector<8x64xf32>, vector<64x256xf32>, vector<8x256xf32> -> vector<8x256xf32>
    %330 = arith.addf %328, %329 : vector<8x256xf32>
    %cst_81 = arith.constant 5.000000e-01 : f32
    %331 = vector.broadcast %cst_81 : f32 to vector<8x256xf32>
    %332 = arith.mulf %331, %330 : vector<8x256xf32>
    %333 = math.tanh %332 : vector<8x256xf32>
    %cst_82 = arith.constant 5.000000e-01 : f32
    %334 = vector.broadcast %cst_82 : f32 to vector<8x256xf32>
    %335 = arith.mulf %334, %333 : vector<8x256xf32>
    %cst_83 = arith.constant 5.000000e-01 : f32
    %336 = vector.broadcast %cst_83 : f32 to vector<8x256xf32>
    %337 = arith.addf %335, %336 : vector<8x256xf32>
    %338 = math.tanh %330 : vector<8x256xf32>
    %339 = vector.extract_strided_slice %337 {offsets = [0, 64], sizes = [8, 64], strides = [1, 1]} : vector<8x256xf32> to vector<8x64xf32>
    %340 = arith.mulf %339, %323 : vector<8x64xf32>
    %341 = vector.extract_strided_slice %337 {offsets = [0, 0], sizes = [8, 64], strides = [1, 1]} : vector<8x256xf32> to vector<8x64xf32>
    %342 = vector.extract_strided_slice %338 {offsets = [0, 128], sizes = [8, 64], strides = [1, 1]} : vector<8x256xf32> to vector<8x64xf32>
    %343 = arith.mulf %341, %342 : vector<8x64xf32>
    %344 = arith.addf %340, %343 : vector<8x64xf32>
    %345 = vector.extract_strided_slice %337 {offsets = [0, 192], sizes = [8, 64], strides = [1, 1]} : vector<8x256xf32> to vector<8x64xf32>
    %346 = math.tanh %344 : vector<8x64xf32>
    %347 = arith.mulf %345, %346 : vector<8x64xf32>
    %348 = vector.extract_strided_slice %347 {offsets = [0, 32], sizes = [8, 32], strides = [1, 1]} : vector<8x64xf32> to vector<8x32xf32>
    %349 = vector.extract_strided_slice %347 {offsets = [0, 0], sizes = [8, 32], strides = [1, 1]} : vector<8x64xf32> to vector<8x32xf32>
    %350 = vector.extract_strided_slice %344 {offsets = [0, 0], sizes = [8, 32], strides = [1, 1]} : vector<8x64xf32> to vector<8x32xf32>
    %351 = tpu.concatenate %201, %222, %243, %264, %285, %306, %327, %348 in 0 : vector<8x32xf32>, vector<8x32xf32>, vector<8x32xf32>, vector<8x32xf32>, vector<8x32xf32>, vector<8x32xf32>, vector<8x32xf32>, vector<8x32xf32> -> vector<64x32xf32>
    %c0_84 = arith.constant 0 : index
    %c0_85 = arith.constant 0 : index
    %352 = vector.load %arg9[%c0_84, %c0_85] : memref<32x128xf32, #tpu.memory_space<vmem>>, vector<32x128xf32>
    %cst_86 = arith.constant dense<0.000000e+00> : vector<64x128xf32>
    %353 = tpu.matmul %351, %352, %cst_86 {dimension_numbers = #tpu.dot_dimension_numbers<[1], [0], [0], [1], [0, 0, 1, 1], [], []>} : vector<64x32xf32>, vector<32x128xf32>, vector<64x128xf32> -> vector<64x128xf32>
    %c0_87 = arith.constant 0 : index
    %c0_88 = arith.constant 0 : index
    %354 = vector.load %arg11[%c0_87, %c0_88] : memref<1x128xf32, #tpu.memory_space<vmem>>, vector<1x128xf32>
    %355 = vector.broadcast %354 : vector<1x128xf32> to vector<64x128xf32>
    %356 = arith.addf %353, %355 : vector<64x128xf32>
    %c0_89 = arith.constant 0 : index
    %c0_90 = arith.constant 0 : index
    %357 = vector.load %arg10[%c0_89, %c0_90] : memref<32x128xf32, #tpu.memory_space<vmem>>, vector<32x128xf32>
    %358 = vector.extract_strided_slice %356 {offsets = [0, 0], sizes = [8, 128], strides = [1, 1]} : vector<64x128xf32> to vector<8x128xf32>
    %cst_91 = arith.constant dense<0.000000e+00> : vector<8x128xf32>
    %359 = tpu.matmul %349, %357, %cst_91 {dimension_numbers = #tpu.dot_dimension_numbers<[1], [0], [0], [1], [0, 0, 1, 1], [], []>} : vector<8x32xf32>, vector<32x128xf32>, vector<8x128xf32> -> vector<8x128xf32>
    %360 = arith.addf %358, %359 : vector<8x128xf32>
    %cst_92 = arith.constant 5.000000e-01 : f32
    %361 = vector.broadcast %cst_92 : f32 to vector<8x128xf32>
    %362 = arith.mulf %361, %360 : vector<8x128xf32>
    %363 = math.tanh %362 : vector<8x128xf32>
    %cst_93 = arith.constant 5.000000e-01 : f32
    %364 = vector.broadcast %cst_93 : f32 to vector<8x128xf32>
    %365 = arith.mulf %364, %363 : vector<8x128xf32>
    %cst_94 = arith.constant 5.000000e-01 : f32
    %366 = vector.broadcast %cst_94 : f32 to vector<8x128xf32>
    %367 = arith.addf %365, %366 : vector<8x128xf32>
    %368 = math.tanh %360 : vector<8x128xf32>
    %369 = vector.extract_strided_slice %367 {offsets = [0, 32], sizes = [8, 32], strides = [1, 1]} : vector<8x128xf32> to vector<8x32xf32>
    %370 = arith.mulf %369, %350 : vector<8x32xf32>
    %371 = vector.extract_strided_slice %367 {offsets = [0, 0], sizes = [8, 32], strides = [1, 1]} : vector<8x128xf32> to vector<8x32xf32>
    %372 = vector.extract_strided_slice %368 {offsets = [0, 64], sizes = [8, 32], strides = [1, 1]} : vector<8x128xf32> to vector<8x32xf32>
    %373 = arith.mulf %371, %372 : vector<8x32xf32>
    %374 = arith.addf %370, %373 : vector<8x32xf32>
    %375 = vector.extract_strided_slice %367 {offsets = [0, 96], sizes = [8, 32], strides = [1, 1]} : vector<8x128xf32> to vector<8x32xf32>
    %376 = math.tanh %374 : vector<8x32xf32>
    %377 = arith.mulf %375, %376 : vector<8x32xf32>
    %c0_95 = arith.constant 0 : index
    %c0_96 = arith.constant 0 : index
    %378 = vector.load %arg13[%c0_95, %c0_96] : memref<8x256xf32, #tpu.memory_space<vmem>>, vector<8x32xf32>
    tpu.vector_store %arg13[%c0_95, %c0_96], %377 {strides = array<i32>} : memref<8x256xf32, #tpu.memory_space<vmem>>, vector<8x32xf32>,
    %379 = vector.extract_strided_slice %356 {offsets = [8, 0], sizes = [8, 128], strides = [1, 1]} : vector<64x128xf32> to vector<8x128xf32>
    %cst_97 = arith.constant dense<0.000000e+00> : vector<8x128xf32>
    %380 = tpu.matmul %377, %357, %cst_97 {dimension_numbers = #tpu.dot_dimension_numbers<[1], [0], [0], [1], [0, 0, 1, 1], [], []>} : vector<8x32xf32>, vector<32x128xf32>, vector<8x128xf32> -> vector<8x128xf32>
    %381 = arith.addf %379, %380 : vector<8x128xf32>
    %cst_98 = arith.constant 5.000000e-01 : f32
    %382 = vector.broadcast %cst_98 : f32 to vector<8x128xf32>
    %383 = arith.mulf %382, %381 : vector<8x128xf32>
    %384 = math.tanh %383 : vector<8x128xf32>
    %cst_99 = arith.constant 5.000000e-01 : f32
    %385 = vector.broadcast %cst_99 : f32 to vector<8x128xf32>
    %386 = arith.mulf %385, %384 : vector<8x128xf32>
    %cst_100 = arith.constant 5.000000e-01 : f32
    %387 = vector.broadcast %cst_100 : f32 to vector<8x128xf32>
    %388 = arith.addf %386, %387 : vector<8x128xf32>
    %389 = math.tanh %381 : vector<8x128xf32>
    %390 = vector.extract_strided_slice %388 {offsets = [0, 32], sizes = [8, 32], strides = [1, 1]} : vector<8x128xf32> to vector<8x32xf32>
    %391 = arith.mulf %390, %374 : vector<8x32xf32>
    %392 = vector.extract_strided_slice %388 {offsets = [0, 0], sizes = [8, 32], strides = [1, 1]} : vector<8x128xf32> to vector<8x32xf32>
    %393 = vector.extract_strided_slice %389 {offsets = [0, 64], sizes = [8, 32], strides = [1, 1]} : vector<8x128xf32> to vector<8x32xf32>
    %394 = arith.mulf %392, %393 : vector<8x32xf32>
    %395 = arith.addf %391, %394 : vector<8x32xf32>
    %396 = vector.extract_strided_slice %388 {offsets = [0, 96], sizes = [8, 32], strides = [1, 1]} : vector<8x128xf32> to vector<8x32xf32>
    %397 = math.tanh %395 : vector<8x32xf32>
    %398 = arith.mulf %396, %397 : vector<8x32xf32>
    %c0_101 = arith.constant 0 : index
    %c32 = arith.constant 32 : index
    %399 = vector.load %arg13[%c0_101, %c32] : memref<8x256xf32, #tpu.memory_space<vmem>>, vector<8x32xf32>
    tpu.vector_store %arg13[%c0_101, %c32], %398 {strides = array<i32>} : memref<8x256xf32, #tpu.memory_space<vmem>>, vector<8x32xf32>,
    %400 = vector.extract_strided_slice %356 {offsets = [16, 0], sizes = [8, 128], strides = [1, 1]} : vector<64x128xf32> to vector<8x128xf32>
    %cst_102 = arith.constant dense<0.000000e+00> : vector<8x128xf32>
    %401 = tpu.matmul %398, %357, %cst_102 {dimension_numbers = #tpu.dot_dimension_numbers<[1], [0], [0], [1], [0, 0, 1, 1], [], []>} : vector<8x32xf32>, vector<32x128xf32>, vector<8x128xf32> -> vector<8x128xf32>
    %402 = arith.addf %400, %401 : vector<8x128xf32>
    %cst_103 = arith.constant 5.000000e-01 : f32
    %403 = vector.broadcast %cst_103 : f32 to vector<8x128xf32>
    %404 = arith.mulf %403, %402 : vector<8x128xf32>
    %405 = math.tanh %404 : vector<8x128xf32>
    %cst_104 = arith.constant 5.000000e-01 : f32
    %406 = vector.broadcast %cst_104 : f32 to vector<8x128xf32>
    %407 = arith.mulf %406, %405 : vector<8x128xf32>
    %cst_105 = arith.constant 5.000000e-01 : f32
    %408 = vector.broadcast %cst_105 : f32 to vector<8x128xf32>
    %409 = arith.addf %407, %408 : vector<8x128xf32>
    %410 = math.tanh %402 : vector<8x128xf32>
    %411 = vector.extract_strided_slice %409 {offsets = [0, 32], sizes = [8, 32], strides = [1, 1]} : vector<8x128xf32> to vector<8x32xf32>
    %412 = arith.mulf %411, %395 : vector<8x32xf32>
    %413 = vector.extract_strided_slice %409 {offsets = [0, 0], sizes = [8, 32], strides = [1, 1]} : vector<8x128xf32> to vector<8x32xf32>
    %414 = vector.extract_strided_slice %410 {offsets = [0, 64], sizes = [8, 32], strides = [1, 1]} : vector<8x128xf32> to vector<8x32xf32>
    %415 = arith.mulf %413, %414 : vector<8x32xf32>
    %416 = arith.addf %412, %415 : vector<8x32xf32>
    %417 = vector.extract_strided_slice %409 {offsets = [0, 96], sizes = [8, 32], strides = [1, 1]} : vector<8x128xf32> to vector<8x32xf32>
    %418 = math.tanh %416 : vector<8x32xf32>
    %419 = arith.mulf %417, %418 : vector<8x32xf32>
    %c0_106 = arith.constant 0 : index
    %c64 = arith.constant 64 : index
    %420 = vector.load %arg13[%c0_106, %c64] : memref<8x256xf32, #tpu.memory_space<vmem>>, vector<8x32xf32>
    tpu.vector_store %arg13[%c0_106, %c64], %419 {strides = array<i32>} : memref<8x256xf32, #tpu.memory_space<vmem>>, vector<8x32xf32>,
    %421 = vector.extract_strided_slice %356 {offsets = [24, 0], sizes = [8, 128], strides = [1, 1]} : vector<64x128xf32> to vector<8x128xf32>
    %cst_107 = arith.constant dense<0.000000e+00> : vector<8x128xf32>
    %422 = tpu.matmul %419, %357, %cst_107 {dimension_numbers = #tpu.dot_dimension_numbers<[1], [0], [0], [1], [0, 0, 1, 1], [], []>} : vector<8x32xf32>, vector<32x128xf32>, vector<8x128xf32> -> vector<8x128xf32>
    %423 = arith.addf %421, %422 : vector<8x128xf32>
    %cst_108 = arith.constant 5.000000e-01 : f32
    %424 = vector.broadcast %cst_108 : f32 to vector<8x128xf32>
    %425 = arith.mulf %424, %423 : vector<8x128xf32>
    %426 = math.tanh %425 : vector<8x128xf32>
    %cst_109 = arith.constant 5.000000e-01 : f32
    %427 = vector.broadcast %cst_109 : f32 to vector<8x128xf32>
    %428 = arith.mulf %427, %426 : vector<8x128xf32>
    %cst_110 = arith.constant 5.000000e-01 : f32
    %429 = vector.broadcast %cst_110 : f32 to vector<8x128xf32>
    %430 = arith.addf %428, %429 : vector<8x128xf32>
    %431 = math.tanh %423 : vector<8x128xf32>
    %432 = vector.extract_strided_slice %430 {offsets = [0, 32], sizes = [8, 32], strides = [1, 1]} : vector<8x128xf32> to vector<8x32xf32>
    %433 = arith.mulf %432, %416 : vector<8x32xf32>
    %434 = vector.extract_strided_slice %430 {offsets = [0, 0], sizes = [8, 32], strides = [1, 1]} : vector<8x128xf32> to vector<8x32xf32>
    %435 = vector.extract_strided_slice %431 {offsets = [0, 64], sizes = [8, 32], strides = [1, 1]} : vector<8x128xf32> to vector<8x32xf32>
    %436 = arith.mulf %434, %435 : vector<8x32xf32>
    %437 = arith.addf %433, %436 : vector<8x32xf32>
    %438 = vector.extract_strided_slice %430 {offsets = [0, 96], sizes = [8, 32], strides = [1, 1]} : vector<8x128xf32> to vector<8x32xf32>
    %439 = math.tanh %437 : vector<8x32xf32>
    %440 = arith.mulf %438, %439 : vector<8x32xf32>
    %c0_111 = arith.constant 0 : index
    %c96 = arith.constant 96 : index
    %441 = vector.load %arg13[%c0_111, %c96] : memref<8x256xf32, #tpu.memory_space<vmem>>, vector<8x32xf32>
    tpu.vector_store %arg13[%c0_111, %c96], %440 {strides = array<i32>} : memref<8x256xf32, #tpu.memory_space<vmem>>, vector<8x32xf32>,
    %442 = vector.extract_strided_slice %356 {offsets = [32, 0], sizes = [8, 128], strides = [1, 1]} : vector<64x128xf32> to vector<8x128xf32>
    %cst_112 = arith.constant dense<0.000000e+00> : vector<8x128xf32>
    %443 = tpu.matmul %440, %357, %cst_112 {dimension_numbers = #tpu.dot_dimension_numbers<[1], [0], [0], [1], [0, 0, 1, 1], [], []>} : vector<8x32xf32>, vector<32x128xf32>, vector<8x128xf32> -> vector<8x128xf32>
    %444 = arith.addf %442, %443 : vector<8x128xf32>
    %cst_113 = arith.constant 5.000000e-01 : f32
    %445 = vector.broadcast %cst_113 : f32 to vector<8x128xf32>
    %446 = arith.mulf %445, %444 : vector<8x128xf32>
    %447 = math.tanh %446 : vector<8x128xf32>
    %cst_114 = arith.constant 5.000000e-01 : f32
    %448 = vector.broadcast %cst_114 : f32 to vector<8x128xf32>
    %449 = arith.mulf %448, %447 : vector<8x128xf32>
    %cst_115 = arith.constant 5.000000e-01 : f32
    %450 = vector.broadcast %cst_115 : f32 to vector<8x128xf32>
    %451 = arith.addf %449, %450 : vector<8x128xf32>
    %452 = math.tanh %444 : vector<8x128xf32>
    %453 = vector.extract_strided_slice %451 {offsets = [0, 32], sizes = [8, 32], strides = [1, 1]} : vector<8x128xf32> to vector<8x32xf32>
    %454 = arith.mulf %453, %437 : vector<8x32xf32>
    %455 = vector.extract_strided_slice %451 {offsets = [0, 0], sizes = [8, 32], strides = [1, 1]} : vector<8x128xf32> to vector<8x32xf32>
    %456 = vector.extract_strided_slice %452 {offsets = [0, 64], sizes = [8, 32], strides = [1, 1]} : vector<8x128xf32> to vector<8x32xf32>
    %457 = arith.mulf %455, %456 : vector<8x32xf32>
    %458 = arith.addf %454, %457 : vector<8x32xf32>
    %459 = vector.extract_strided_slice %451 {offsets = [0, 96], sizes = [8, 32], strides = [1, 1]} : vector<8x128xf32> to vector<8x32xf32>
    %460 = math.tanh %458 : vector<8x32xf32>
    %461 = arith.mulf %459, %460 : vector<8x32xf32>
    %c0_116 = arith.constant 0 : index
    %c128 = arith.constant 128 : index
    %462 = vector.load %arg13[%c0_116, %c128] : memref<8x256xf32, #tpu.memory_space<vmem>>, vector<8x32xf32>
    tpu.vector_store %arg13[%c0_116, %c128], %461 {strides = array<i32>} : memref<8x256xf32, #tpu.memory_space<vmem>>, vector<8x32xf32>,
    %463 = vector.extract_strided_slice %356 {offsets = [40, 0], sizes = [8, 128], strides = [1, 1]} : vector<64x128xf32> to vector<8x128xf32>
    %cst_117 = arith.constant dense<0.000000e+00> : vector<8x128xf32>
    %464 = tpu.matmul %461, %357, %cst_117 {dimension_numbers = #tpu.dot_dimension_numbers<[1], [0], [0], [1], [0, 0, 1, 1], [], []>} : vector<8x32xf32>, vector<32x128xf32>, vector<8x128xf32> -> vector<8x128xf32>
    %465 = arith.addf %463, %464 : vector<8x128xf32>
    %cst_118 = arith.constant 5.000000e-01 : f32
    %466 = vector.broadcast %cst_118 : f32 to vector<8x128xf32>
    %467 = arith.mulf %466, %465 : vector<8x128xf32>
    %468 = math.tanh %467 : vector<8x128xf32>
    %cst_119 = arith.constant 5.000000e-01 : f32
    %469 = vector.broadcast %cst_119 : f32 to vector<8x128xf32>
    %470 = arith.mulf %469, %468 : vector<8x128xf32>
    %cst_120 = arith.constant 5.000000e-01 : f32
    %471 = vector.broadcast %cst_120 : f32 to vector<8x128xf32>
    %472 = arith.addf %470, %471 : vector<8x128xf32>
    %473 = math.tanh %465 : vector<8x128xf32>
    %474 = vector.extract_strided_slice %472 {offsets = [0, 32], sizes = [8, 32], strides = [1, 1]} : vector<8x128xf32> to vector<8x32xf32>
    %475 = arith.mulf %474, %458 : vector<8x32xf32>
    %476 = vector.extract_strided_slice %472 {offsets = [0, 0], sizes = [8, 32], strides = [1, 1]} : vector<8x128xf32> to vector<8x32xf32>
    %477 = vector.extract_strided_slice %473 {offsets = [0, 64], sizes = [8, 32], strides = [1, 1]} : vector<8x128xf32> to vector<8x32xf32>
    %478 = arith.mulf %476, %477 : vector<8x32xf32>
    %479 = arith.addf %475, %478 : vector<8x32xf32>
    %480 = vector.extract_strided_slice %472 {offsets = [0, 96], sizes = [8, 32], strides = [1, 1]} : vector<8x128xf32> to vector<8x32xf32>
    %481 = math.tanh %479 : vector<8x32xf32>
    %482 = arith.mulf %480, %481 : vector<8x32xf32>
    %c0_121 = arith.constant 0 : index
    %c160 = arith.constant 160 : index
    %483 = vector.load %arg13[%c0_121, %c160] : memref<8x256xf32, #tpu.memory_space<vmem>>, vector<8x32xf32>
    tpu.vector_store %arg13[%c0_121, %c160], %482 {strides = array<i32>} : memref<8x256xf32, #tpu.memory_space<vmem>>, vector<8x32xf32>,
    %484 = vector.extract_strided_slice %356 {offsets = [48, 0], sizes = [8, 128], strides = [1, 1]} : vector<64x128xf32> to vector<8x128xf32>
    %cst_122 = arith.constant dense<0.000000e+00> : vector<8x128xf32>
    %485 = tpu.matmul %482, %357, %cst_122 {dimension_numbers = #tpu.dot_dimension_numbers<[1], [0], [0], [1], [0, 0, 1, 1], [], []>} : vector<8x32xf32>, vector<32x128xf32>, vector<8x128xf32> -> vector<8x128xf32>
    %486 = arith.addf %484, %485 : vector<8x128xf32>
    %cst_123 = arith.constant 5.000000e-01 : f32
    %487 = vector.broadcast %cst_123 : f32 to vector<8x128xf32>
    %488 = arith.mulf %487, %486 : vector<8x128xf32>
    %489 = math.tanh %488 : vector<8x128xf32>
    %cst_124 = arith.constant 5.000000e-01 : f32
    %490 = vector.broadcast %cst_124 : f32 to vector<8x128xf32>
    %491 = arith.mulf %490, %489 : vector<8x128xf32>
    %cst_125 = arith.constant 5.000000e-01 : f32
    %492 = vector.broadcast %cst_125 : f32 to vector<8x128xf32>
    %493 = arith.addf %491, %492 : vector<8x128xf32>
    %494 = math.tanh %486 : vector<8x128xf32>
    %495 = vector.extract_strided_slice %493 {offsets = [0, 32], sizes = [8, 32], strides = [1, 1]} : vector<8x128xf32> to vector<8x32xf32>
    %496 = arith.mulf %495, %479 : vector<8x32xf32>
    %497 = vector.extract_strided_slice %493 {offsets = [0, 0], sizes = [8, 32], strides = [1, 1]} : vector<8x128xf32> to vector<8x32xf32>
    %498 = vector.extract_strided_slice %494 {offsets = [0, 64], sizes = [8, 32], strides = [1, 1]} : vector<8x128xf32> to vector<8x32xf32>
    %499 = arith.mulf %497, %498 : vector<8x32xf32>
    %500 = arith.addf %496, %499 : vector<8x32xf32>
    %501 = vector.extract_strided_slice %493 {offsets = [0, 96], sizes = [8, 32], strides = [1, 1]} : vector<8x128xf32> to vector<8x32xf32>
    %502 = math.tanh %500 : vector<8x32xf32>
    %503 = arith.mulf %501, %502 : vector<8x32xf32>
    %c0_126 = arith.constant 0 : index
    %c192 = arith.constant 192 : index
    %504 = vector.load %arg13[%c0_126, %c192] : memref<8x256xf32, #tpu.memory_space<vmem>>, vector<8x32xf32>
    tpu.vector_store %arg13[%c0_126, %c192], %503 {strides = array<i32>} : memref<8x256xf32, #tpu.memory_space<vmem>>, vector<8x32xf32>,
    %505 = vector.extract_strided_slice %356 {offsets = [56, 0], sizes = [8, 128], strides = [1, 1]} : vector<64x128xf32> to vector<8x128xf32>
    %cst_127 = arith.constant dense<0.000000e+00> : vector<8x128xf32>
    %506 = tpu.matmul %503, %357, %cst_127 {dimension_numbers = #tpu.dot_dimension_numbers<[1], [0], [0], [1], [0, 0, 1, 1], [], []>} : vector<8x32xf32>, vector<32x128xf32>, vector<8x128xf32> -> vector<8x128xf32>
    %507 = arith.addf %505, %506 : vector<8x128xf32>
    %cst_128 = arith.constant 5.000000e-01 : f32
    %508 = vector.broadcast %cst_128 : f32 to vector<8x128xf32>
    %509 = arith.mulf %508, %507 : vector<8x128xf32>
    %510 = math.tanh %509 : vector<8x128xf32>
    %cst_129 = arith.constant 5.000000e-01 : f32
    %511 = vector.broadcast %cst_129 : f32 to vector<8x128xf32>
    %512 = arith.mulf %511, %510 : vector<8x128xf32>
    %cst_130 = arith.constant 5.000000e-01 : f32
    %513 = vector.broadcast %cst_130 : f32 to vector<8x128xf32>
    %514 = arith.addf %512, %513 : vector<8x128xf32>
    %515 = math.tanh %507 : vector<8x128xf32>
    %516 = vector.extract_strided_slice %514 {offsets = [0, 32], sizes = [8, 32], strides = [1, 1]} : vector<8x128xf32> to vector<8x32xf32>
    %517 = arith.mulf %516, %500 : vector<8x32xf32>
    %518 = vector.extract_strided_slice %514 {offsets = [0, 0], sizes = [8, 32], strides = [1, 1]} : vector<8x128xf32> to vector<8x32xf32>
    %519 = vector.extract_strided_slice %515 {offsets = [0, 64], sizes = [8, 32], strides = [1, 1]} : vector<8x128xf32> to vector<8x32xf32>
    %520 = arith.mulf %518, %519 : vector<8x32xf32>
    %521 = arith.addf %517, %520 : vector<8x32xf32>
    %522 = vector.extract_strided_slice %514 {offsets = [0, 96], sizes = [8, 32], strides = [1, 1]} : vector<8x128xf32> to vector<8x32xf32>
    %523 = math.tanh %521 : vector<8x32xf32>
    %524 = arith.mulf %522, %523 : vector<8x32xf32>
    %c0_131 = arith.constant 0 : index
    %c224 = arith.constant 224 : index
    %525 = vector.load %arg13[%c0_131, %c224] : memref<8x256xf32, #tpu.memory_space<vmem>>, vector<8x32xf32>
    tpu.vector_store %arg13[%c0_131, %c224], %524 {strides = array<i32>} : memref<8x256xf32, #tpu.memory_space<vmem>>, vector<8x32xf32>,
    %526 = tpu.concatenate %167, %349, %164, %350 in 1 : vector<8x32xf32>, vector<8x32xf32>, vector<8x32xf32>, vector<8x32xf32> -> vector<8x128xf32>
    %c0_132 = arith.constant 0 : index
    %c0_133 = arith.constant 0 : index
    %527 = vector.load %arg12[%c0_132, %c0_133] : memref<8x128xf32, #tpu.memory_space<vmem>>, vector<8x128xf32>
    tpu.vector_store %arg12[%c0_132, %c0_133], %526 {strides = array<i32>} : memref<8x128xf32, #tpu.memory_space<vmem>>, vector<8x128xf32>,
    return
  }
}

</mosaic_0001>

<bundles_post_ra>
// kernel: reverse
= control target key start
LH: loop header
LB: loop body
LE: loop exit
PB: predicated region body
PF: predicated region fallthrough
CT: control target
= control target key end

     0   :  { %2 = vsyncpa [#allocation2], 0  ;;  %s112_s0 = inlined_call_operand.vmem [shape: f32[2,32,8], index: 0, kind: input, shape index: {}]   ;;  %s113_s1 = inlined_call_operand.hbm [shape: f32[2,32,8], index: 1, kind: output, shape index: {}]  }
   0x1   :  { %v33_v0 = vld [vmem:[%s112_s0] sm:$0xff]  ;;  %v35_v1 = vld [vmem:[%s112_s0 + $0x8] sm:$0xff]  ;;  %s90_s0 = smov [#allocation1]  }
   0x2   :  { %34 = vst [vmem:[#allocation0] sm:$0xff] %v33_v0  ;;  %36 = vst [vmem:[#allocation0 + $0x8] sm:$0xff] %v35_v1  ;;  %s51_s10 = sshll.u32 %s90_s0, 4  ;;  %s52_s10 = int_to_ptr.vmem [resolvable:$true] %s51_s10 }
   0x3   :  { %s68_s11 = scalar_lea.vmem %s52_s10, 256  ;;  %p73_p1 = scmp.lt.s32.totalorder %s52_s10, %s52_s10 }
   0x4   :  { %p69_p0 = scmp.ne.s32.totalorder %s52_s10, %s68_s11  ;;  %p74_p2 = scmp.lt.s32.totalorder %s68_s11, %s68_s11 }
   0x6   :  { %p75_p3 = por %p74_p2, %p73_p1 }
   0x8   :  { %p76_p4 = pnand %p75_p3, %p69_p0 }
   0x9   :  { %v41_v2 = vld [vmem:[#allocation0 + $0x7] ss:$-1 sm:$0xff]  ;;  %v46_v3 = vld [vmem:[#allocation0 + $0xf] ss:$-1 sm:$0xff] }
   0xa   :  { %42 = vst [vmem:[#allocation1] sm:$0xff] %v41_v2  ;;  %47 = vst [vmem:[#allocation1 + $0x8] sm:$0xff] %v46_v3 }
   0xb   :  { %79 = shalt.err (!%p76_p4)
}
   0xc   :  { %s91_s12 = smov 128   ;;  %s92_s13 = smov 8  }
   0xd   :  { %57 = dma.vmem_to_hbm [thread:$0]  %s52_s10, 256, %s113_s1, [#allocation2], %s91_s12, %s91_s12, %s92_s13  }
   0xe   :  { %88 = dma.done.wait [#allocation2], 256  }
   0xf   :  { %89 = vsyncadd [#allocation2], 4294967040 }
  0x10   :  { %59 = vsyncpa [#allocation2], 1 }

// kernel: lstm_autoencoder_forward.1
= control target key start
LH: loop header
LB: loop body
LE: loop exit
PB: predicated region body
PF: predicated region fallthrough
CT: control target
= control target key end

     0   :  { %vm84_vm0 = vcmask 1043456   ;;  %vm59_vm1 = vcmask 31744   ;;  %v3606_v5 = vmov 0.0   ;;  %vm3607_vm2 = vmmov 0   ;;  %s3608_s30 = smov 64   ;;  %s4643_s2 = inlined_call_operand.vmem [shape: f32[4,128], index: 2, kind: input, shape index: {}]   ;;  %s4644_s0 = inlined_call_operand.vmem [shape: f32[64,4], index: 0, kind: input, shape index: {}]   ;;  %s4645_s3 = inlined_call_operand.vmem [shape: f32[32,128], index: 3, kind: input, shape index: {}]   ;;  %s4646_s4 = inlined_call_operand.vmem [shape: f32[1,128], index: 4, kind: input, shape index: {}]   ;;  %s4647_s5 = inlined_call_operand.vmem [shape: f32[32,256], index: 5, kind: input, shape index: {}]   ;;  %s4648_s6 = inlined_call_operand.vmem [shape: f32[4,256], index: 6, kind: input, shape index: {}]   ;;  %s4649_s1 = inlined_call_operand.vmem [shape: f32[64,4], index: 1, kind: input, shape index: {}]   ;;  %s4650_s7 = inlined_call_operand.vmem [shape: f32[64,256], index: 7, kind: input, shape index: {}]   ;;  %s4651_s8 = inlined_call_operand.vmem [shape: f32[1,256], index: 8, kind: input, shape index: {}]   ;;  %s4652_s9 = inlined_call_operand.vmem [shape: f32[32,128], index: 9, kind: input, shape index: {}]   ;;  %s4653_s10 = inlined_call_operand.vmem [shape: f32[32,128], index: 10, kind: input, shape index: {}]   ;;  %s4654_s11 = inlined_call_operand.vmem [shape: f32[1,128], index: 11, kind: input, shape index: {}]   ;;  %s4655_s13 = inlined_call_operand.vmem [shape: f32[8,256], index: 13, kind: output, shape index: {1}]   ;;  %s4656_s12 = inlined_call_operand.vmem [shape: f32[8,128], index: 12, kind: output, shape index: {0}]  }
   0x1   :  { %v51_v0 = vld [vmem:[%s4643_s2] sm:$0xf]  ;;  %v48_v2 = vld [vmem:[%s4644_s0 + $0x28] sm:$0xff]  ;;  %v3695_v3 = vld [vmem:[%s4645_s3 + $0x18] sm:$0xff]  ;;  %vm197_vm3 = vcmask 261120   ;;  %vm1307_vm4 = vcmask 523264  }
   0x2   :  { %v47_v1 = vld [vmem:[%s4644_s0 + $0x20] sm:$0xff]  ;;  %3438 = vmatprep.subr.msk.mxu1 %vm84_vm0, %v51_v0  ;;  %3228 = vmatprep.subr.msk.mxu0 %vm84_vm0, %v51_v0  ;;  %v44_v6 = vld [vmem:[%s4644_s0 + $0x8] sm:$0xff]  ;;  %v49_v7 = vld [vmem:[%s4644_s0 + $0x30] sm:$0xff]  ;;  %vm2436_vm5 = vcmask 523520   ;;  %vm2539_vm6 = vcmask 785920   ;;  %vm2638_vm7 = vcmask 1048320  }
   0x3   :  { %3236 = vmatprep.mubr.msk.f32.mxu1 %vm59_vm1, %v47_v1  ;;  %3439 = vmatpush3.msk.msra.mxu1 %vm84_vm0, %v51_v0  ;;  %v43_v4 = vld [vmem:[%s4644_s0] sm:$0xff]  ;;  %v3715_v8 = vld [vmem:[%s4645_s3 + $0x10] sm:$0xff]  ;;  %v50_v9 = vld [vmem:[%s4644_s0 + $0x38] sm:$0xff]  ;;  %vm3056_vm8 = vcmask 785408  }
   0x4   :  { %3237 = vmatmul.mubr.msk.f32.vlgmr.msra.gmra.mxu1 %vm59_vm1, %v48_v2  ;;  %3242 = vmatprep.subr.mxu1 %v3606_v5  ;;  %v3727_v10 = vld [vmem:[%s4645_s3 + $0x8] sm:$0xff]  ;;  %v3736_v11 = vld [vmem:[%s4645_s3] sm:$0xff]  ;;  %v45_v51 = vld [vmem:[%s4644_s0 + $0x10] sm:$0xff] }
   0x5   :  { %3243 = vmatpush3.msra.mxu1 %v3695_v3  ;;  %3229 = vmatpush3.msk.msra.mxu0 %vm84_vm0, %v51_v0  ;;  %v3772_v17 = vld [vmem:[%s4646_s4] ss:$0 sm:$0xff]  ;;  %s3609_s4 = smov 32   ;;  %v46_v52 = vld [vmem:[%s4644_s0 + $0x18] sm:$0xff] }
   0x6   :  { %3230 = vmatprep.mubr.msk.f32.mxu0 %vm59_vm1, %v43_v4  ;;  %3244 = vmatprep.subr.mxu1 %v3606_v5 }
   0x7   :  { %3231 = vmatmul.mubr.msk.f32.vlgmr.msra.gmra.mxu0 %vm59_vm1, %v44_v6  ;;  %3239 = vmatprep.mubr.msk.f32.mxu1 %vm59_vm1, %v49_v7 }
   0x8   :  { %3245 = vmatpush3.msra.mxu1 %v3715_v8  ;;  %3264 = vmatprep.subr.mxu0 %v3606_v5 }
   0x9   :  { %3240 = vmatmul.mubr.msk.f32.gmra.mxu1 %vm59_vm1, %v50_v9  ;;  %3246 = vmatprep.subr.mxu1 %v3606_v5 }
   0xa   :  { %3247 = vmatpush3.msra.mxu1 %v3727_v10  ;;  %3250 = vmatprep.mubr.msk.f32.mxu1 %vm3607_vm2, %v3606_v5 }
   0xb   :  { %3248 = vmatprep.subr.mxu1 %v3606_v5  ;;  %3265 = vmatpush3.msra.mxu0 %v3695_v3 }
   0xc   :  { %3249 = vmatpush3.msra.mxu1 %v3736_v11  ;;  %3266 = vmatprep.subr.mxu0 %v3606_v5 }
   0xd   :  { %3251 = vmatmul.mubr.f32.vlgmr.msra.gmra.mxu1 %v3606_v5  ;;  %3253 = vmatprep.subr.mxu1 %v3606_v5 }
   0xe   :  { %3254 = vmatpush3.msra.mxu1 %v3695_v3  ;;  %3261 = vmatprep.mubr.msk.f32.mxu1 %vm3607_vm2, %v3606_v5 }
   0xf   :  { %3255 = vmatprep.subr.mxu1 %v3606_v5  ;;  %3267 = vmatpush3.msra.mxu0 %v3715_v8 }
  0x10   :  { %3256 = vmatpush3.msra.mxu1 %v3715_v8  ;;  %3268 = vmatprep.subr.mxu0 %v3606_v5 }
  0x11   :  { %3257 = vmatprep.subr.mxu1 %v3606_v5  ;;  %3269 = vmatpush3.msra.mxu0 %v3727_v10 }
  0x12   :  { %3258 = vmatpush3.msra.mxu1 %v3727_v10  ;;  %3270 = vmatprep.subr.mxu0 %v3606_v5 }
  0x13   :  { %3259 = vmatprep.subr.mxu1 %v3606_v5  ;;  %3271 = vmatpush3.msra.mxu0 %v3736_v11 }
  0x14   :  { %3260 = vmatpush3.msra.mxu1 %v3736_v11  ;;  %3286 = vmatprep.subr.mxu0 %v3606_v5 }
  0x15   :  { %3275 = vmatprep.subr.mxu1 %v3606_v5  ;;  %3233 = vmatprep.mubr.msk.f32.mxu0 %vm59_vm1, %v45_v51 }
  0x16   :  { %3234 = vmatmul.mubr.msk.f32.gmra.mxu0 %vm59_vm1, %v46_v52 }
  0x17   :  { %3272 = vmatprep.mubr.msk.f32.mxu0 %vm3607_vm2, %v3606_v5 }
  0xc4   :  { %v3763_v12 = vpop.f32.mrf.mxu1 }
  0xc6   :  { %v3765_v13 = vpop.f32.mrf.mxu1 }
  0xc7   :  { %v3232_v14 = vpop.f32.mrf.mxu0 }
  0xc8   :  { %v160_v37 = vadd.f32 %v3232_v14, %v3772_v17 }
  0xc9   :  { %v3767_v15 = vpop.f32.mrf.mxu1  ;;  %v154_v16 = vpop.f32.mrf.mxu0 }
  0xca   :  { %v155_v19 = vadd.f32 %v3772_v17, %v154_v16 }
  0xcb   :  { %v3774_v18 = vpop.f32.mrf.mxu1 }
  0xcd   :  { %v267_v20 = vpop.f32.mrf.mxu1 }
  0xce   :  { %v271_v21 = vadd.f32 %v267_v20, %v155_v19 }
  0xcf   :  { %v3252_v22 = vpop.f32.mrf.mxu1 }
  0xd0   :  { %3446 = vtanh.f32 %v271_v21  ;;  %v272_v24 = vmul.f32 0.5, %v271_v21 }
  0xd2   :  { %3448 = vtanh.f32 %v272_v24 }
  0xd6   :  { %v3235_v57 = vpop.f32.mrf.mxu0 }
  0xd8   :  { %v164_v58 = vpop.f32.mrf.mxu0 }
  0xd9   :  { %v165_v59 = vadd.f32 %v3772_v17, %v164_v58 }
  0xdd   :  { %v3447_v23 = vpop.eup %3446 }
  0xde   :  { %279 = vrot.lane.b32.xlu0 %v3447_v23, %s3608_s30  ;;  %v170_v23 = vadd.f32 %v3235_v57, %v3772_v17 }
  0xdf   :  { %v3449_v25 = vpop.eup %3448 }
  0xe0   :  { %v274_v26 = vmul.f32 0.5, %v3449_v25 }
  0xe2   :  { %v275_v27 = vadd.f32 0.5, %v274_v26 }
  0xe4   :  { %v277_v30 = vmul.f32 0.0, %v275_v27 }
 0x150   :  { %v280_v28 = vpop.permute.xlu0 %279 }
 0x151   :  { %v282_v29 = vmul.f32 %v280_v28, %v275_v27 }
 0x153   :  { %284 = vrot.lane.b32.xlu0 %v282_v29, %s3609_s4 }
 0x1c5   :  { %v285_v31 = vpop.permute.xlu0 %284 }
 0x1c6   :  { %v287_v32 = vadd.f32 %v285_v31, %v277_v30 }
 0x1c8   :  { %3450 = vtanh.f32 %v287_v32 }
 0x1d5   :  { %v3451_v33 = vpop.eup %3450 }
 0x1d6   :  { %290 = vrot.lane.b32.xlu1 %v3451_v33, %s3608_s30 }
 0x248   :  { %v291_v34 = vpop.permute.xlu1 %290 }
 0x249   :  { %v293_v35 = vmul.f32 %v291_v34, %v275_v27 }
 0x24b   :  { %295 = vrot.lane.b32.xlu1 %v293_v35, %s3609_s4 }
 0x2bd   :  { %v3781_v36 = vpop.permute.xlu1 %295 }
 0x2be   :  { %3262 = vmatmul.mubr.msk.f32.vlgmr.msra.gmra.mxu1 %vm197_vm3, %v3781_v36 }
 0x2bf   :  { %3276 = vmatpush3.msra.mxu1 %v3695_v3  ;;  %3283 = vmatprep.mubr.msk.f32.mxu1 %vm3607_vm2, %v3606_v5 }
 0x2c0   :  { %3277 = vmatprep.subr.mxu1 %v3606_v5 }
 0x2c1   :  { %3278 = vmatpush3.msra.mxu1 %v3715_v8 }
 0x2c2   :  { %3279 = vmatprep.subr.mxu1 %v3606_v5 }
 0x2c3   :  { %3280 = vmatpush3.msra.mxu1 %v3727_v10 }
 0x2c4   :  { %3281 = vmatprep.subr.mxu1 %v3606_v5 }
 0x2c5   :  { %3282 = vmatpush3.msra.mxu1 %v3736_v11 }
 0x2c6   :  { %3297 = vmatprep.subr.mxu1 %v3606_v5 }
 0x37e   :  { %v365_v38 = vpop.f32.mrf.mxu1 }
 0x37f   :  { %v369_v39 = vadd.f32 %v365_v38, %v160_v37 }
 0x380   :  { %v3263_v40 = vpop.f32.mrf.mxu1 }
 0x381   :  { %3452 = vtanh.f32 %v369_v39  ;;  %v370_v42 = vmul.f32 0.5, %v369_v39 }
 0x383   :  { %3454 = vtanh.f32 %v370_v42  ;;  %v175_v42 = vadd.f32 %v3772_v17, %v3765_v13 }
 0x38e   :  { %v3453_v41 = vpop.eup %3452 }
 0x38f   :  { %377 = vrot.lane.b32.xlu0 %v3453_v41, %s3608_s30 }
 0x390   :  { %v3455_v43 = vpop.eup %3454 }
 0x391   :  { %v372_v44 = vmul.f32 0.5, %v3455_v43 }
 0x393   :  { %v373_v45 = vadd.f32 0.5, %v372_v44 }
 0x395   :  { %v375_v48 = vmul.f32 %v373_v45, %v287_v32 }
 0x401   :  { %v378_v46 = vpop.permute.xlu0 %377 }
 0x402   :  { %v380_v47 = vmul.f32 %v378_v46, %v373_v45 }
 0x404   :  { %382 = vrot.lane.b32.xlu1 %v380_v47, %s3609_s4 }
 0x476   :  { %v383_v49 = vpop.permute.xlu1 %382 }
 0x477   :  { %v385_v50 = vadd.f32 %v383_v49, %v375_v48 }
 0x479   :  { %3456 = vtanh.f32 %v385_v50 }
 0x486   :  { %v3457_v53 = vpop.eup %3456 }
 0x487   :  { %388 = vrot.lane.b32.xlu0 %v3457_v53, %s3608_s30 }
 0x4f9   :  { %v389_v54 = vpop.permute.xlu0 %388 }
 0x4fa   :  { %v391_v55 = vmul.f32 %v389_v54, %v373_v45 }
 0x4fc   :  { %393 = vrot.lane.b32.xlu1 %v391_v55, %s3609_s4 }
 0x56e   :  { %v3810_v56 = vpop.permute.xlu1 %393 }
 0x56f   :  { %3273 = vmatmul.mubr.msk.f32.vlgmr.msra.gmra.mxu0 %vm197_vm3, %v3810_v56 }
 0x570   :  { %3287 = vmatpush3.msra.mxu0 %v3695_v3  ;;  %3294 = vmatprep.mubr.msk.f32.mxu0 %vm3607_vm2, %v3606_v5 }
 0x571   :  { %3288 = vmatprep.subr.mxu0 %v3606_v5 }
 0x572   :  { %3289 = vmatpush3.msra.mxu0 %v3715_v8 }
 0x573   :  { %3290 = vmatprep.subr.mxu0 %v3606_v5 }
 0x574   :  { %3291 = vmatpush3.msra.mxu0 %v3727_v10 }
 0x575   :  { %3292 = vmatprep.subr.mxu0 %v3606_v5 }
 0x576   :  { %3293 = vmatpush3.msra.mxu0 %v3736_v11 }
 0x577   :  { %3308 = vmatprep.subr.mxu0 %v3606_v5 }
 0x62f   :  { %v463_v60 = vpop.f32.mrf.mxu0 }
 0x630   :  { %v467_v61 = vadd.f32 %v463_v60, %v165_v59  ;;  %v180_v60 = vadd.f32 %v3763_v12, %v3772_v17 }
 0x631   :  { %v3274_v62 = vpop.f32.mrf.mxu0 }
 0x632   :  { %3458 = vtanh.f32 %v467_v61  ;;  %v468_v0 = vmul.f32 0.5, %v467_v61 }
 0x634   :  { %3460 = vtanh.f32 %v468_v0 }
 0x63f   :  { %v3459_v63 = vpop.eup %3458 }
 0x640   :  { %475 = vrot.lane.b32.xlu0 %v3459_v63, %s3608_s30 }
 0x641   :  { %v3461_v1 = vpop.eup %3460 }
 0x642   :  { %v470_v2 = vmul.f32 0.5, %v3461_v1 }
 0x644   :  { %v471_v4 = vadd.f32 0.5, %v470_v2 }
 0x646   :  { %v473_v9 = vmul.f32 %v471_v4, %v385_v50 }
 0x6b2   :  { %v476_v6 = vpop.permute.xlu0 %475 }
 0x6b3   :  { %v478_v7 = vmul.f32 %v476_v6, %v471_v4 }
 0x6b5   :  { %480 = vrot.lane.b32.xlu1 %v478_v7, %s3609_s4 }
 0x727   :  { %v481_v14 = vpop.permute.xlu1 %480 }
 0x728   :  { %v483_v16 = vadd.f32 %v481_v14, %v473_v9 }
 0x72a   :  { %3462 = vtanh.f32 %v483_v16 }
 0x737   :  { %v3463_v19 = vpop.eup %3462 }
 0x738   :  { %486 = vrot.lane.b32.xlu0 %v3463_v19, %s3608_s30  ;;  %v185_v19 = vadd.f32 %v3772_v17, %v3774_v18  ;;  %v987_v18 = vld [vmem:[%s4647_s5 + $0x38] sm:$0xff] }
 0x7aa   :  { %v487_v20 = vpop.permute.xlu0 %486 }
 0x7ab   :  { %v489_v21 = vmul.f32 %v487_v20, %v471_v4 }
 0x7ad   :  { %491 = vrot.lane.b32.xlu1 %v489_v21, %s3609_s4 }
 0x81f   :  { %v3829_v22 = vpop.permute.xlu1 %491 }
 0x820   :  { %3284 = vmatmul.mubr.msk.f32.vlgmr.msra.gmra.mxu1 %vm197_vm3, %v3829_v22 }
 0x821   :  { %3298 = vmatpush3.msra.mxu1 %v3695_v3  ;;  %3305 = vmatprep.mubr.msk.f32.mxu1 %vm3607_vm2, %v3606_v5 }
 0x822   :  { %3299 = vmatprep.subr.mxu1 %v3606_v5 }
 0x823   :  { %3300 = vmatpush3.msra.mxu1 %v3715_v8 }
 0x824   :  { %3301 = vmatprep.subr.mxu1 %v3606_v5 }
 0x825   :  { %3302 = vmatpush3.msra.mxu1 %v3727_v10 }
 0x826   :  { %3303 = vmatprep.subr.mxu1 %v3606_v5 }
 0x827   :  { %3304 = vmatpush3.msra.mxu1 %v3736_v11 }
 0x828   :  { %3319 = vmatprep.subr.mxu1 %v3606_v5 }
 0x8e0   :  { %v561_v24 = vpop.f32.mrf.mxu1 }
 0x8e1   :  { %v565_v25 = vadd.f32 %v561_v24, %v170_v23 }
 0x8e2   :  { %v3285_v26 = vpop.f32.mrf.mxu1 }
 0x8e3   :  { %3464 = vtanh.f32 %v565_v25  ;;  %v566_v28 = vmul.f32 0.5, %v565_v25 }
 0x8e5   :  { %3466 = vtanh.f32 %v566_v28 }
 0x8f0   :  { %v3465_v27 = vpop.eup %3464 }
 0x8f1   :  { %573 = vrot.lane.b32.xlu0 %v3465_v27, %s3608_s30 }
 0x8f2   :  { %v3467_v29 = vpop.eup %3466 }
 0x8f3   :  { %v568_v30 = vmul.f32 0.5, %v3467_v29 }
 0x8f5   :  { %v569_v31 = vadd.f32 0.5, %v568_v30 }
 0x8f7   :  { %v571_v34 = vmul.f32 %v569_v31, %v483_v16 }
 0x963   :  { %v574_v32 = vpop.permute.xlu0 %573 }
 0x964   :  { %v576_v33 = vmul.f32 %v574_v32, %v569_v31 }
 0x966   :  { %578 = vrot.lane.b32.xlu1 %v576_v33, %s3609_s4 }
 0x9d8   :  { %v579_v35 = vpop.permute.xlu1 %578 }
 0x9d9   :  { %v581_v37 = vadd.f32 %v579_v35, %v571_v34  ;;  %v988_v35 = vld [vmem:[%s4648_s6] sm:$0xff] }
 0x9db   :  { %3468 = vtanh.f32 %v581_v37 }
 0x9e8   :  { %v3469_v38 = vpop.eup %3468 }
 0x9e9   :  { %584 = vrot.lane.b32.xlu0 %v3469_v38, %s3608_s30  ;;  %v1006_v38 = vld [vmem:[%s4649_s1] sm:$0xff] }
 0xa5b   :  { %v585_v39 = vpop.permute.xlu0 %584 }
 0xa5c   :  { %v587_v40 = vmul.f32 %v585_v39, %v569_v31  ;;  %v1007_v39 = vld [vmem:[%s4649_s1 + $0x8] sm:$0xff] }
 0xa5e   :  { %589 = vrot.lane.b32.xlu1 %v587_v40, %s3609_s4 }
 0xad0   :  { %v3848_v41 = vpop.permute.xlu1 %589 }
 0xad1   :  { %3295 = vmatmul.mubr.msk.f32.vlgmr.msra.gmra.mxu0 %vm197_vm3, %v3848_v41 }
 0xad2   :  { %3309 = vmatpush3.msra.mxu0 %v3695_v3  ;;  %3316 = vmatprep.mubr.msk.f32.mxu0 %vm3607_vm2, %v3606_v5 }
 0xad3   :  { %3310 = vmatprep.subr.mxu0 %v3606_v5 }
 0xad4   :  { %3311 = vmatpush3.msra.mxu0 %v3715_v8 }
 0xad5   :  { %3312 = vmatprep.subr.mxu0 %v3606_v5 }
 0xad6   :  { %3313 = vmatpush3.msra.mxu0 %v3727_v10 }
 0xad7   :  { %3314 = vmatprep.subr.mxu0 %v3606_v5 }
 0xad8   :  { %3315 = vmatpush3.msra.mxu0 %v3736_v11 }
 0xb91   :  { %v659_v43 = vpop.f32.mrf.mxu0 }
 0xb92   :  { %v663_v44 = vadd.f32 %v659_v43, %v175_v42  ;;  %v1008_v43 = vld [vmem:[%s4649_s1 + $0x10] sm:$0xff] }
 0xb93   :  { %v3296_v45 = vpop.f32.mrf.mxu0 }
 0xb94   :  { %3470 = vtanh.f32 %v663_v44  ;;  %v664_v47 = vmul.f32 0.5, %v663_v44  ;;  %v1009_v44 = vld [vmem:[%s4649_s1 + $0x18] sm:$0xff]  ;;  %v1010_v45 = vld [vmem:[%s4649_s1 + $0x20] sm:$0xff] }
 0xb96   :  { %3472 = vtanh.f32 %v664_v47  ;;  %v1012_v47 = vld [vmem:[%s4649_s1 + $0x30] sm:$0xff] }
 0xba1   :  { %v3471_v46 = vpop.eup %3470 }
 0xba2   :  { %671 = vrot.lane.b32.xlu0 %v3471_v46, %s3608_s30  ;;  %v1011_v46 = vld [vmem:[%s4649_s1 + $0x28] sm:$0xff] }
 0xba3   :  { %v3473_v48 = vpop.eup %3472 }
 0xba4   :  { %v666_v49 = vmul.f32 0.5, %v3473_v48  ;;  %v986_v48 = vld [vmem:[%s4647_s5 + $0x30] sm:$0xff] }
 0xba6   :  { %v667_v50 = vadd.f32 0.5, %v666_v49 }
 0xba8   :  { %v669_v53 = vmul.f32 %v667_v50, %v581_v37  ;;  %v1015_v37 = vcombine.high %v988_v35, %v988_v35 }
 0xbaa   :  { %3084 = vmatprep.subr.msk.mxu0 %vm84_vm0, %v1015_v37 }
 0xc14   :  { %v672_v51 = vpop.permute.xlu0 %671 }
 0xc15   :  { %v674_v52 = vmul.f32 %v672_v51, %v667_v50  ;;  %v984_v51 = vld [vmem:[%s4647_s5 + $0x20] sm:$0xff] }
 0xc17   :  { %676 = vrot.lane.b32.xlu1 %v674_v52, %s3609_s4  ;;  %v983_v52 = vld [vmem:[%s4647_s5 + $0x18] sm:$0xff] }
 0xc89   :  { %v677_v54 = vpop.permute.xlu1 %676 }
 0xc8a   :  { %v679_v55 = vadd.f32 %v677_v54, %v669_v53  ;;  %v982_v53 = vld [vmem:[%s4647_s5 + $0x10] sm:$0xff]  ;;  %v981_v54 = vld [vmem:[%s4647_s5 + $0x8] sm:$0xff] }
 0xc8c   :  { %3474 = vtanh.f32 %v679_v55 }
 0xc99   :  { %v3475_v13 = vpop.eup %3474 }
 0xc9a   :  { %682 = vrot.lane.b32.xlu0 %v3475_v13, %s3608_s30 }
 0xd0c   :  { %v683_v57 = vpop.permute.xlu0 %682 }
 0xd0d   :  { %v685_v58 = vmul.f32 %v683_v57, %v667_v50  ;;  %v985_v50 = vld [vmem:[%s4647_s5 + $0x28] sm:$0xff] }
 0xd0f   :  { %687 = vrot.lane.b32.xlu1 %v685_v58, %s3609_s4 }
 0xd81   :  { %v3867_v59 = vpop.permute.xlu1 %687 }
 0xd82   :  { %3306 = vmatmul.mubr.msk.f32.vlgmr.msra.gmra.mxu1 %vm197_vm3, %v3867_v59 }
 0xd83   :  { %3320 = vmatpush3.msra.mxu1 %v3695_v3  ;;  %3327 = vmatprep.mubr.msk.f32.mxu1 %vm3607_vm2, %v3606_v5 }
 0xd84   :  { %3321 = vmatprep.subr.mxu1 %v3606_v5 }
 0xd85   :  { %3322 = vmatpush3.msra.mxu1 %v3715_v8 }
 0xd86   :  { %3323 = vmatprep.subr.mxu1 %v3606_v5 }
 0xd87   :  { %3324 = vmatpush3.msra.mxu1 %v3727_v10 }
 0xd88   :  { %3325 = vmatprep.subr.mxu1 %v3606_v5 }
 0xd89   :  { %3326 = vmatpush3.msra.mxu1 %v3736_v11 }
 0xd8a   :  { %1186 = vmatprep.subr.mxu1 %v987_v18 }
 0xe42   :  { %v757_v61 = vpop.f32.mrf.mxu1 }
 0xe43   :  { %v761_v3 = vadd.f32 %v757_v61, %v180_v60 }
 0xe44   :  { %v3307_v62 = vpop.f32.mrf.mxu1 }
 0xe45   :  { %3476 = vtanh.f32 %v761_v3  ;;  %v762_v0 = vmul.f32 0.5, %v761_v3 }
 0xe47   :  { %3478 = vtanh.f32 %v762_v0  ;;  %v4004_v0 = vld [vmem:[%s4650_s7 + $0x78] sm:$0xff] }
 0xe52   :  { %v3477_v63 = vpop.eup %3476 }
 0xe53   :  { %769 = vrot.lane.b32.xlu0 %v3477_v63, %s3608_s30  ;;  %v1013_v63 = vld [vmem:[%s4649_s1 + $0x38] sm:$0xff] }
 0xe54   :  { %v3479_v8 = vpop.eup %3478 }
 0xe55   :  { %v764_v1 = vmul.f32 0.5, %v3479_v8  ;;  %v4009_v8 = vld [vmem:[%s4650_s7 + $0x70] sm:$0xff] }
 0xe57   :  { %v765_v2 = vadd.f32 0.5, %v764_v1  ;;  %v4014_v1 = vld [vmem:[%s4650_s7 + $0x68] sm:$0xff] }
 0xe59   :  { %v767_v11 = vmul.f32 %v765_v2, %v679_v55  ;;  %v980_v55 = vld [vmem:[%s4647_s5] sm:$0xff] }
 0xec5   :  { %v770_v10 = vpop.permute.xlu0 %769 }
 0xec6   :  { %v772_v4 = vmul.f32 %v770_v10, %v765_v2  ;;  %v4028_v10 = vld [vmem:[%s4650_s7 + $0x58] sm:$0xff] }
 0xec8   :  { %774 = vrot.lane.b32.xlu1 %v772_v4, %s3609_s4  ;;  %v4035_v4 = vld [vmem:[%s4650_s7 + $0x50] sm:$0xff] }
 0xf3a   :  { %v775_v6 = vpop.permute.xlu1 %774 }
 0xf3b   :  { %v777_v7 = vadd.f32 %v775_v6, %v767_v11  ;;  %v4042_v11 = vld [vmem:[%s4650_s7 + $0x48] sm:$0xff]  ;;  %v4049_v6 = vld [vmem:[%s4650_s7 + $0x40] sm:$0xff] }
 0xf3d   :  { %3480 = vtanh.f32 %v777_v7 }
 0xf4a   :  { %v3481_v12 = vpop.eup %3480 }
 0xf4b   :  { %780 = vrot.lane.b32.xlu0 %v3481_v12, %s3608_s30  ;;  %v4063_v12 = vld [vmem:[%s4650_s7 + $0x30] sm:$0xff] }
 0xfbd   :  { %v781_v9 = vpop.permute.xlu0 %780 }
 0xfbe   :  { %v783_v14 = vmul.f32 %v781_v9, %v765_v2  ;;  %v4021_v2 = vld [vmem:[%s4650_s7 + $0x60] sm:$0xff] }
 0xfc0   :  { %785 = vrot.lane.b32.xlu1 %v783_v14, %s3609_s4  ;;  %v4070_v14 = vld [vmem:[%s4650_s7 + $0x28] sm:$0xff] }
0x1032   :  { %v3886_v16 = vpop.permute.xlu1 %785 }
0x1033   :  { %3317 = vmatmul.mubr.msk.f32.vlgmr.msra.gmra.mxu0 %vm197_vm3, %v3886_v16 }
0x1034   :  { %1108 = vmatprep.mubr.f32.mxu0 %v3606_v5  ;;  %3085 = vmatpush1.msk.msra.mxu0 %vm84_vm0, %v988_v35 }
0x1035   :  { %1327 = vmatprep.subr.mxu0 %v4004_v0 }
0x1037   :  { %3086 = vmatmul.mubr.msk.f32.vlgmr.msra.gmra.mxu0 %vm59_vm1, %v1006_v38 }
0x1038   :  { %1114 = vmatprep.mubr.f32.mxu0 %v3606_v5  ;;  %1328 = vmatpush1.msra.mxu0 %v4009_v8 }
0x1039   :  { %1329 = vmatprep.subr.mxu0 %v4014_v1 }
0x103a   :  { %1330 = vmatpush1.msra.mxu0 %v4021_v2 }
0x103b   :  { %3087 = vmatmul.mubr.msk.f32.gmra.mxu0 %vm59_vm1, %v1007_v39  ;;  %1331 = vmatprep.subr.mxu0 %v4028_v10 }
0x103c   :  { %1120 = vmatprep.mubr.f32.mxu0 %v3606_v5  ;;  %1332 = vmatpush1.msra.mxu0 %v4035_v4 }
0x103d   :  { %1333 = vmatprep.subr.mxu0 %v4042_v11 }
0x103e   :  { %1334 = vmatpush1.msra.mxu0 %v4049_v6 }
0x103f   :  { %3088 = vmatmul.mubr.msk.f32.gmra.mxu0 %vm59_vm1, %v1008_v43  ;;  %v1276_v43 = vlaneseq }
0x1040   :  { %1126 = vmatprep.mubr.f32.mxu0 %v3606_v5 }
0x1043   :  { %3089 = vmatmul.mubr.msk.f32.gmra.mxu0 %vm59_vm1, %v1009_v44 }
0x1044   :  { %1132 = vmatprep.mubr.f32.mxu0 %v3606_v5 }
0x1047   :  { %3090 = vmatmul.mubr.msk.f32.gmra.mxu0 %vm59_vm1, %v1010_v45  ;;  %v1277_v45 = vshrl.u32 %v1276_v43, 7 }
0x1048   :  { %1138 = vmatprep.mubr.f32.mxu0 %v3606_v5 }
0x104b   :  { %3091 = vmatmul.mubr.msk.f32.gmra.mxu0 %vm59_vm1, %v1011_v46 }
0x104c   :  { %1144 = vmatprep.mubr.f32.mxu0 %v3606_v5 }
0x104f   :  { %3092 = vmatmul.mubr.msk.f32.gmra.mxu0 %vm59_vm1, %v1012_v47  ;;  %v1278_v47 = vsub.s32 0, %v1277_v45 }
0x1050   :  { %1150 = vmatprep.mubr.f32.mxu0 %v3606_v5 }
0x1053   :  { %3093 = vmatmul.mubr.msk.f32.gmra.mxu0 %vm59_vm1, %v1013_v63 }
0x1054   :  { %1375 = vmatprep.mubr.f32.mxu0 %v3606_v5 }
0x10f3   :  { %v855_v20 = vpop.f32.mrf.mxu0 }
0x10f4   :  { %v859_v21 = vadd.f32 %v855_v20, %v185_v19  ;;  %v4084_v19 = vld [vmem:[%s4650_s7 + $0x18] sm:$0xff]  ;;  %v4091_v20 = vld [vmem:[%s4650_s7 + $0x10] sm:$0xff] }
0x10f5   :  { %v3318_v23 = vpop.f32.mrf.mxu0 }
0x10f6   :  { %3482 = vtanh.f32 %v859_v21  ;;  %v860_v25 = vmul.f32 0.5, %v859_v21  ;;  %v4100_v23 = vld [vmem:[%s4650_s7 + $0x8] sm:$0xff] }
0x10f8   :  { %3484 = vtanh.f32 %v860_v25 }
0x1103   :  { %v3483_v24 = vpop.eup %3482 }
0x1104   :  { %867 = vrot.lane.b32.xlu0 %v3483_v24, %s3608_s30  ;;  %v4108_v24 = vld [vmem:[%s4650_s7] sm:$0xff] }
0x1105   :  { %v3485_v26 = vpop.eup %3484 }
0x1106   :  { %v862_v27 = vmul.f32 0.5, %v3485_v26 }
0x1108   :  { %v863_v28 = vadd.f32 0.5, %v862_v27 }
0x110a   :  { %v865_v31 = vmul.f32 %v863_v28, %v777_v7  ;;  %v4056_v7 = vld [vmem:[%s4650_s7 + $0x38] sm:$0xff] }
0x110b   :  { %1335 = vmatprep.subr.mxu0 %v4056_v7 }
0x110c   :  { %1336 = vmatpush1.msra.mxu0 %v4063_v12 }
0x110d   :  { %1337 = vmatprep.subr.mxu0 %v4070_v14 }
0x1176   :  { %v868_v29 = vpop.permute.xlu0 %867 }
0x1177   :  { %v870_v30 = vmul.f32 %v868_v29, %v863_v28 }
0x1179   :  { %872 = vrot.lane.b32.xlu1 %v870_v30, %s3609_s4 }
0x11eb   :  { %v873_v32 = vpop.permute.xlu1 %872 }
0x11ec   :  { %v3895_v33 = vadd.f32 %v873_v32, %v865_v31  ;;  %v1110_v31 = vpop.f32.mrf.mxu0 }
0x11ee   :  { %3486 = vtanh.f32 %v3895_v33  ;;  %v1112_v32 = vpop.f32.mrf.mxu0 }
0x11fb   :  { %v3487_v34 = vpop.eup %3486 }
0x11fc   :  { %878 = vrot.lane.b32.xlu0 %v3487_v34, %s3608_s30 }
0x126e   :  { %v879_v40 = vpop.permute.xlu0 %878 }
0x126f   :  { %v881_v42 = vmul.f32 %v879_v40, %v863_v28 }
0x1271   :  { %883 = vrot.lane.b32.xlu1 %v881_v42, %s3609_s4 }
0x12e3   :  { %v884_v49 = vpop.permute.xlu1 %883 }
0x12e4   :  { %3328 = vmatmul.mubr.msk.f32.vlgmr.msra.gmra.mxu1 %vm197_vm3, %v884_v49 }
0x12e5   :  { %1187 = vmatpush1.msra.mxu1 %v986_v48  ;;  %1226 = vmatprep.mubr.f32.mxu1 %v3606_v5 }
0x12e6   :  { %1188 = vmatprep.subr.mxu1 %v985_v50  ;;  %v1005_v50 = vld [vmem:[%s4651_s8] sm:$0x3] }
0x12e7   :  { %1189 = vmatpush1.msra.mxu1 %v984_v51 }
0x12e8   :  { %1190 = vmatprep.subr.mxu1 %v983_v52 }
0x12e9   :  { %1191 = vmatpush1.msra.mxu1 %v982_v53  ;;  %v4179_v53 = vrot.slane %v1005_v50, %v1278_v47 }
0x12ea   :  { %1192 = vmatprep.subr.mxu1 %v981_v54  ;;  %v1282_v54 = vsub.s32 1, %v1277_v45 }
0x12eb   :  { %1193 = vmatpush1.msra.mxu1 %v980_v55 }
0x12ec   :  { %3094 = vmatmul.mubr.msk.f32.vlgmr.msra.gmra.mxu1 %vm197_vm3, %v3781_v36  ;;  %v190_v36 = vadd.f32 %v3767_v15, %v3772_v17  ;;  %1427 = vmatprep.subr.mxu1 %v4004_v0 }
0x12ed   :  { %1232 = vmatprep.mubr.f32.mxu1 %v3606_v5  ;;  %1428 = vmatpush1.msra.mxu1 %v4009_v8 }
0x12ee   :  { %1429 = vmatprep.subr.mxu1 %v4014_v1 }
0x12ef   :  { %1430 = vmatpush1.msra.mxu1 %v4021_v2 }
0x12f0   :  { %3095 = vmatmul.mubr.msk.f32.gmra.mxu1 %vm197_vm3, %v3810_v56  ;;  %1431 = vmatprep.subr.mxu1 %v4028_v10 }
0x12f1   :  { %1238 = vmatprep.mubr.f32.mxu1 %v3606_v5  ;;  %1432 = vmatpush1.msra.mxu1 %v4035_v4 }
0x12f2   :  { %1433 = vmatprep.subr.mxu1 %v4042_v11 }
0x12f3   :  { %1434 = vmatpush1.msra.mxu1 %v4049_v6 }
0x12f4   :  { %3096 = vmatmul.mubr.msk.f32.gmra.mxu1 %vm197_vm3, %v3829_v22  ;;  %1435 = vmatprep.subr.mxu1 %v4056_v7 }
0x12f5   :  { %1244 = vmatprep.mubr.f32.mxu1 %v3606_v5  ;;  %1436 = vmatpush1.msra.mxu1 %v4063_v12 }
0x12f6   :  { %1437 = vmatprep.subr.mxu1 %v4070_v14 }
0x12f8   :  { %3097 = vmatmul.mubr.msk.f32.gmra.mxu1 %vm197_vm3, %v3848_v41 }
0x12f9   :  { %1250 = vmatprep.mubr.f32.mxu1 %v3606_v5 }
0x12fc   :  { %3098 = vmatmul.mubr.msk.f32.gmra.mxu1 %vm197_vm3, %v3867_v59 }
0x12fd   :  { %1256 = vmatprep.mubr.f32.mxu1 %v3606_v5 }
0x1300   :  { %3099 = vmatmul.mubr.msk.f32.gmra.mxu1 %vm197_vm3, %v3886_v16  ;;  %v4078_v16 = vld [vmem:[%s4650_s7 + $0x20] sm:$0xff] }
0x1301   :  { %1262 = vmatprep.mubr.f32.mxu1 %v3606_v5  ;;  %1338 = vmatpush1.msra.mxu0 %v4078_v16 }
0x1302   :  { %1339 = vmatprep.subr.mxu0 %v4084_v19  ;;  %1438 = vmatpush1.msra.mxu1 %v4078_v16 }
0x1303   :  { %1340 = vmatpush1.msra.mxu0 %v4091_v20  ;;  %1439 = vmatprep.subr.mxu1 %v4084_v19 }
0x1304   :  { %3100 = vmatmul.mubr.msk.f32.gmra.mxu1 %vm197_vm3, %v884_v49  ;;  %1341 = vmatprep.subr.mxu0 %v4100_v23 }
0x1305   :  { %1268 = vmatprep.mubr.f32.mxu1 %v3606_v5  ;;  %1342 = vmatpush1.msra.mxu0 %v4108_v24 }
0x1306   :  { %1440 = vmatpush1.msra.mxu1 %v4091_v20  ;;  %1523 = vmatprep.subr.mxu0 %v4004_v0 }
0x1307   :  { %1441 = vmatprep.subr.mxu1 %v4100_v23 }
0x1308   :  { %1442 = vmatpush1.msra.mxu1 %v4108_v24 }
0x1309   :  { %1619 = vmatprep.subr.mxu1 %v4004_v0 }
0x13a4   :  { %v953_v56 = vpop.f32.mrf.mxu1 }
0x13a5   :  { %v957_v22 = vadd.f32 %v953_v56, %v190_v36 }
0x13a6   :  { %v3329_v41 = vpop.f32.mrf.mxu1 }
0x13a7   :  { %3488 = vtanh.f32 %v957_v22  ;;  %v958_v57 = vmul.f32 0.5, %v957_v22  ;;  %v4184_v41 = vrot.slane %v1005_v50, %v1282_v54 }
0x13a9   :  { %3490 = vtanh.f32 %v958_v57 }
0x13ac   :  { %v1228_v48 = vpop.f32.mrf.mxu1 }
0x13ad   :  { %v1229_v52 = vadd.f32 %v1228_v48, %v1110_v31 }
0x13ae   :  { %v1230_v55 = vpop.f32.mrf.mxu1 }
0x13af   :  { %v1231_v56 = vadd.f32 %v1230_v55, %v1112_v32  ;;  %v1286_v22 = vadd.f32 %v4179_v53, %v1229_v52 }
0x13b4   :  { %v3489_v13 = vpop.eup %3488 }
0x13b5   :  { %965 = vrot.lane.b32.xlu0 %v3489_v13, %s3608_s30 }
0x13b6   :  { %v3491_v58 = vpop.eup %3490 }
0x13b7   :  { %v960_v59 = vmul.f32 0.5, %v3491_v58 }
0x13b9   :  { %v3989_v60 = vadd.f32 0.5, %v960_v59 }
0x13bb   :  { %v963_v15 = vmul.f32 %v3989_v60, %v3895_v33  ;;  %v4150_v33 = vpop.f32.mrf.mxu0 }
0x13bd   :  { %v4152_v18 = vpop.f32.mrf.mxu0 }
0x13bf   :  { %v4154_v34 = vpop.f32.mrf.mxu0 }
0x13c1   :  { %v4156_v35 = vpop.f32.mrf.mxu0 }
0x13c3   :  { %v4158_v37 = vpop.f32.mrf.mxu0 }
0x13c5   :  { %v4160_v38 = vpop.f32.mrf.mxu0 }
0x13c7   :  { %v4162_v39 = vpop.f32.mrf.mxu0 }
0x13c9   :  { %v4164_v40 = vpop.f32.mrf.mxu0 }
0x13cb   :  { %v4166_v42 = vpop.f32.mrf.mxu0 }
0x13cd   :  { %v4168_v44 = vpop.f32.mrf.mxu0 }
0x13cf   :  { %v4170_v46 = vpop.f32.mrf.mxu0 }
0x13d1   :  { %v4172_v49 = vpop.f32.mrf.mxu0 }
0x13d3   :  { %v4177_v51 = vpop.f32.mrf.mxu0 }
0x13d5   :  { %v4181_v36 = vpop.f32.mrf.mxu0 }
0x1427   :  { %v966_v61 = vpop.permute.xlu0 %965 }
0x1428   :  { %v968_v3 = vmul.f32 %v966_v61, %v3989_v60 }
0x142a   :  { %970 = vrot.lane.b32.xlu1 %v968_v3, %s3609_s4 }
0x149c   :  { %v971_v17 = vpop.permute.xlu1 %970 }
0x149d   :  { %v3995_v62 = vadd.f32 %v971_v17, %v963_v15 }
0x149f   :  { %3492 = vtanh.f32 %v3995_v62  ;;  %v1306_v21 = vsel %vm197_vm3, 0.0, %v3995_v62 }
0x14ac   :  { %v3493_v9 = vpop.eup %3492 }
0x14ad   :  { %976 = vrot.lane.b32.xlu0 %v3493_v9, %s3608_s30 }
0x14b1   :  { %1394 = vrot.lane.b32.xlu0 %v1306_v21, %s3608_s30 }
0x151f   :  { %v977_v25 = vpop.permute.xlu0 %976 }
0x1520   :  { %v979_v26 = vmul.f32 %v977_v25, %v3989_v60  ;;  %v1287_v60 = vadd.f32 %v4184_v41, %v1231_v56 }
0x1522   :  { %1158 = vrot.lane.b32.xlu0 %v979_v26, %s3609_s4  ;;  %1302 = vrot.lane.b32.xlu1 %v979_v26, %s3608_s30 }
0x1523   :  { %v4124_v27 = vpop.permute.xlu0 %1394 }
0x1594   :  { %v1303_v28 = vpop.permute.xlu1 %1302  ;;  %v4126_v29 = vpop.permute.xlu0 %1158 }
0x1595   :  { %v1305_v30 = vsel %vm197_vm3, 0.0, %v1303_v28  ;;  %3101 = vmatmul.mubr.msk.f32.gmra.mxu1 %vm197_vm3, %v4126_v29 }
0x1596   :  { %3102 = vmatmul.mubr.msk.f32.vlgmr.msra.gmra.mxu0 %vm1307_vm4, %v1305_v30  ;;  %1475 = vmatprep.mubr.f32.mxu1 %v3606_v5 }
0x1597   :  { %1524 = vmatpush1.msra.mxu0 %v4009_v8  ;;  %1571 = vmatprep.mubr.f32.mxu0 %v3606_v5 }
0x1598   :  { %1525 = vmatprep.subr.mxu0 %v4014_v1 }
0x1599   :  { %1526 = vmatpush1.msra.mxu0 %v4021_v2 }
0x159a   :  { %1527 = vmatprep.subr.mxu0 %v4028_v10 }
0x159b   :  { %1528 = vmatpush1.msra.mxu0 %v4035_v4 }
0x159c   :  { %1529 = vmatprep.subr.mxu0 %v4042_v11 }
0x159d   :  { %1530 = vmatpush1.msra.mxu0 %v4049_v6 }
0x159e   :  { %1531 = vmatprep.subr.mxu0 %v4056_v7 }
0x159f   :  { %1532 = vmatpush1.msra.mxu0 %v4063_v12 }
0x15a0   :  { %1533 = vmatprep.subr.mxu0 %v4070_v14 }
0x15a1   :  { %1534 = vmatpush1.msra.mxu0 %v4078_v16 }
0x15a2   :  { %1535 = vmatprep.subr.mxu0 %v4084_v19 }
0x15a3   :  { %1536 = vmatpush1.msra.mxu0 %v4091_v20 }
0x15a4   :  { %1537 = vmatprep.subr.mxu0 %v4100_v23 }
0x15a5   :  { %1538 = vmatpush1.msra.mxu0 %v4108_v24 }
0x15a6   :  { %1715 = vmatprep.subr.mxu0 %v4004_v0 }
0x1656   :  { %v1377_v13 = vpop.f32.mrf.mxu0 }
0x1657   :  { %v1382_v57 = vadd.f32 %v1377_v13, %v1286_v22 }
0x1658   :  { %v1379_v58 = vpop.f32.mrf.mxu0 }
0x1659   :  { %v1384_v59 = vmul.f32 0.5, %v1382_v57  ;;  %v1383_v61 = vadd.f32 %v1379_v58, %v1287_v60 }
0x165b   :  { %3494 = vtanh.f32 %v1384_v59  ;;  %v1385_v21 = vmul.f32 0.5, %v1383_v61 }
0x165c   :  { %3496 = vtanh.f32 %v1383_v61 }
0x165d   :  { %3498 = vtanh.f32 %v1385_v21 }
0x1668   :  { %v3495_v3 = vpop.eup %3494 }
0x1669   :  { %v1388_v15 = vmul.f32 0.5, %v3495_v3  ;;  %v3497_v63 = vpop.eup %3496 }
0x166a   :  { %v3499_v30 = vpop.eup %3498 }
0x166b   :  { %v1390_v17 = vadd.f32 0.5, %v1388_v15  ;;  %v1389_v31 = vmul.f32 0.5, %v3499_v30 }
0x166d   :  { %v1398_v9 = vmul.f32 %v3497_v63, %v1390_v17  ;;  %v1397_v25 = vmul.f32 %v4124_v27, %v1390_v17  ;;  %v1391_v32 = vadd.f32 0.5, %v1389_v31  ;;  %v1234_v27 = vpop.f32.mrf.mxu1 }
0x166e   :  { %v1235_v61 = vadd.f32 %v1234_v27, %v4150_v33 }
0x166f   :  { %1400 = vrot.lane.b32.xlu1 %v1398_v9, %s3608_s30  ;;  %v1236_v48 = vpop.f32.mrf.mxu1 }
0x1670   :  { %v1237_v15 = vadd.f32 %v1236_v48, %v4152_v18  ;;  %v1288_v17 = vadd.f32 %v4179_v53, %v1235_v61 }
0x1671   :  { %v1240_v50 = vpop.f32.mrf.mxu1 }
0x1673   :  { %v1242_v52 = vpop.f32.mrf.mxu1 }
0x1675   :  { %v4211_v54 = vpop.f32.mrf.mxu1 }
0x1677   :  { %v4213_v55 = vpop.f32.mrf.mxu1 }
0x1679   :  { %v4215_v56 = vpop.f32.mrf.mxu1 }
0x167b   :  { %v4217_v22 = vpop.f32.mrf.mxu1 }
0x167d   :  { %v4219_v13 = vpop.f32.mrf.mxu1 }
0x167f   :  { %v4221_v57 = vpop.f32.mrf.mxu1 }
0x1681   :  { %v4223_v58 = vpop.f32.mrf.mxu1 }
0x1683   :  { %v4225_v59 = vpop.f32.mrf.mxu1 }
0x1685   :  { %v4227_v60 = vpop.f32.mrf.mxu1 }
0x1687   :  { %v4230_v3 = vpop.f32.mrf.mxu1 }
0x16e1   :  { %v1401_v26 = vpop.permute.xlu1 %1400 }
0x16e2   :  { %v1403_v28 = vadd.f32 %v1401_v26, %v1397_v25  ;;  %v1289_v26 = vadd.f32 %v4184_v41, %v1237_v15 }
0x16e4   :  { %3500 = vtanh.f32 %v1403_v28 }
0x16f1   :  { %v3501_v43 = vpop.eup %3500 }
0x16f2   :  { %v4189_v45 = vmul.f32 %v3501_v43, %v1391_v32 }
0x16f4   :  { %1407 = vrot.lane.b32.xlu1 %v4189_v45, %s3608_s30 }
0x1766   :  { %v1408_v47 = vpop.permute.xlu1 %1407 }
0x1767   :  { %3103 = vmatmul.mubr.msk.f32.vlgmr.msra.gmra.mxu1 %vm1307_vm4, %v1408_v47 }
0x1768   :  { %1620 = vmatpush1.msra.mxu1 %v4009_v8  ;;  %1667 = vmatprep.mubr.f32.mxu1 %v3606_v5 }
0x1769   :  { %1621 = vmatprep.subr.mxu1 %v4014_v1 }
0x176a   :  { %1622 = vmatpush1.msra.mxu1 %v4021_v2 }
0x176b   :  { %1623 = vmatprep.subr.mxu1 %v4028_v10 }
0x176c   :  { %1624 = vmatpush1.msra.mxu1 %v4035_v4 }
0x176d   :  { %1625 = vmatprep.subr.mxu1 %v4042_v11 }
0x176e   :  { %1626 = vmatpush1.msra.mxu1 %v4049_v6 }
0x176f   :  { %1627 = vmatprep.subr.mxu1 %v4056_v7 }
0x1770   :  { %1628 = vmatpush1.msra.mxu1 %v4063_v12 }
0x1771   :  { %1629 = vmatprep.subr.mxu1 %v4070_v14 }
0x1772   :  { %1630 = vmatpush1.msra.mxu1 %v4078_v16 }
0x1773   :  { %1631 = vmatprep.subr.mxu1 %v4084_v19 }
0x1774   :  { %1632 = vmatpush1.msra.mxu1 %v4091_v20 }
0x1775   :  { %1633 = vmatprep.subr.mxu1 %v4100_v23 }
0x1776   :  { %1634 = vmatpush1.msra.mxu1 %v4108_v24 }
0x1777   :  { %1811 = vmatprep.subr.mxu1 %v4004_v0 }
0x1827   :  { %v1477_v63 = vpop.f32.mrf.mxu1 }
0x1828   :  { %v1482_v9 = vadd.f32 %v1477_v63, %v1288_v17 }
0x1829   :  { %v1479_v21 = vpop.f32.mrf.mxu1 }
0x182a   :  { %v1484_v25 = vmul.f32 0.5, %v1482_v9  ;;  %v1483_v30 = vadd.f32 %v1479_v21, %v1289_v26  ;;  %v1243_v26 = vadd.f32 %v1242_v52, %v4156_v35 }
0x182c   :  { %3502 = vtanh.f32 %v1484_v25  ;;  %v1485_v27 = vmul.f32 0.5, %v1483_v30 }
0x182d   :  { %3504 = vtanh.f32 %v1483_v30 }
0x182e   :  { %3506 = vtanh.f32 %v1485_v27 }
0x1839   :  { %v3503_v31 = vpop.eup %3502 }
0x183a   :  { %v1488_v32 = vmul.f32 0.5, %v3503_v31  ;;  %v3505_v47 = vpop.eup %3504 }
0x183b   :  { %v3507_v17 = vpop.eup %3506 }
0x183c   :  { %v1490_v43 = vadd.f32 0.5, %v1488_v32  ;;  %v1489_v63 = vmul.f32 0.5, %v3507_v17 }
0x183e   :  { %v1494_v33 = vmul.f32 %v3505_v47, %v1490_v43  ;;  %v1493_v18 = vmul.f32 %v1490_v43, %v1403_v28  ;;  %v1491_v9 = vadd.f32 0.5, %v1489_v63  ;;  %v1241_v28 = vadd.f32 %v1240_v50, %v4154_v34 }
0x1840   :  { %1496 = vrot.lane.b32.xlu0 %v1494_v33, %s3608_s30  ;;  %v1290_v30 = vadd.f32 %v4179_v53, %v1241_v28  ;;  %v1291_v33 = vadd.f32 %v4184_v41, %v1243_v26 }
0x18b2   :  { %v1497_v48 = vpop.permute.xlu0 %1496 }
0x18b3   :  { %v1499_v61 = vadd.f32 %v1497_v48, %v1493_v18 }
0x18b5   :  { %3508 = vtanh.f32 %v1499_v61 }
0x18c2   :  { %v3509_v15 = vpop.eup %3508 }
0x18c3   :  { %v4236_v25 = vmul.f32 %v3509_v15, %v1491_v9 }
0x18c5   :  { %1503 = vrot.lane.b32.xlu1 %v4236_v25, %s3608_s30 }
0x1937   :  { %v1504_v21 = vpop.permute.xlu1 %1503 }
0x1938   :  { %3104 = vmatmul.mubr.msk.f32.vlgmr.msra.gmra.mxu0 %vm1307_vm4, %v1504_v21 }
0x1939   :  { %1716 = vmatpush1.msra.mxu0 %v4009_v8  ;;  %1763 = vmatprep.mubr.f32.mxu0 %v3606_v5 }
0x193a   :  { %1717 = vmatprep.subr.mxu0 %v4014_v1 }
0x193b   :  { %1718 = vmatpush1.msra.mxu0 %v4021_v2 }
0x193c   :  { %1719 = vmatprep.subr.mxu0 %v4028_v10 }
0x193d   :  { %1720 = vmatpush1.msra.mxu0 %v4035_v4 }
0x193e   :  { %1721 = vmatprep.subr.mxu0 %v4042_v11 }
0x193f   :  { %1722 = vmatpush1.msra.mxu0 %v4049_v6 }
0x1940   :  { %1723 = vmatprep.subr.mxu0 %v4056_v7 }
0x1941   :  { %1724 = vmatpush1.msra.mxu0 %v4063_v12 }
0x1942   :  { %1725 = vmatprep.subr.mxu0 %v4070_v14 }
0x1943   :  { %1726 = vmatpush1.msra.mxu0 %v4078_v16 }
0x1944   :  { %1727 = vmatprep.subr.mxu0 %v4084_v19 }
0x1945   :  { %1728 = vmatpush1.msra.mxu0 %v4091_v20 }
0x1946   :  { %1729 = vmatprep.subr.mxu0 %v4100_v23 }
0x1947   :  { %1730 = vmatpush1.msra.mxu0 %v4108_v24 }
0x1948   :  { %1907 = vmatprep.subr.mxu0 %v4004_v0 }
0x19f8   :  { %v1573_v31 = vpop.f32.mrf.mxu0 }
0x19f9   :  { %v1578_v32 = vadd.f32 %v1573_v31, %v1290_v30 }
0x19fa   :  { %v1575_v43 = vpop.f32.mrf.mxu0 }
0x19fb   :  { %v1580_v47 = vmul.f32 0.5, %v1578_v32  ;;  %v1579_v27 = vadd.f32 %v1575_v43, %v1291_v33  ;;  %v1249_v32 = vadd.f32 %v4213_v55, %v4160_v38 }
0x19fd   :  { %3510 = vtanh.f32 %v1580_v47  ;;  %v1581_v34 = vmul.f32 0.5, %v1579_v27 }
0x19fe   :  { %3512 = vtanh.f32 %v1579_v27 }
0x19ff   :  { %3514 = vtanh.f32 %v1581_v34 }
0x1a0a   :  { %v3511_v18 = vpop.eup %3510 }
0x1a0b   :  { %v1584_v48 = vmul.f32 0.5, %v3511_v18  ;;  %v3513_v63 = vpop.eup %3512 }
0x1a0c   :  { %v3515_v15 = vpop.eup %3514 }
0x1a0d   :  { %v1586_v17 = vadd.f32 0.5, %v1584_v48  ;;  %v1585_v21 = vmul.f32 0.5, %v3515_v15  ;;  %v1293_v48 = vadd.f32 %v4184_v41, %v1249_v32 }
0x1a0f   :  { %v1590_v9 = vmul.f32 %v3513_v63, %v1586_v17  ;;  %v1589_v35 = vmul.f32 %v1586_v17, %v1499_v61  ;;  %v1587_v28 = vadd.f32 0.5, %v1585_v21  ;;  %v1247_v61 = vadd.f32 %v4211_v54, %v4158_v37 }
0x1a11   :  { %1592 = vrot.lane.b32.xlu0 %v1590_v9, %s3608_s30  ;;  %v1292_v43 = vadd.f32 %v4179_v53, %v1247_v61  ;;  %v1255_v61 = vadd.f32 %v4217_v22, %v4164_v40 }
0x1a83   :  { %v1593_v50 = vpop.permute.xlu0 %1592 }
0x1a84   :  { %v1595_v52 = vadd.f32 %v1593_v50, %v1589_v35 }
0x1a86   :  { %3516 = vtanh.f32 %v1595_v52 }
0x1a93   :  { %v3517_v26 = vpop.eup %3516 }
0x1a94   :  { %v4263_v30 = vmul.f32 %v3517_v26, %v1587_v28 }
0x1a96   :  { %1599 = vrot.lane.b32.xlu1 %v4263_v30, %s3608_s30 }
0x1b08   :  { %v1600_v31 = vpop.permute.xlu1 %1599 }
0x1b09   :  { %3105 = vmatmul.mubr.msk.f32.vlgmr.msra.gmra.mxu1 %vm1307_vm4, %v1600_v31 }
0x1b0a   :  { %1812 = vmatpush1.msra.mxu1 %v4009_v8  ;;  %1859 = vmatprep.mubr.f32.mxu1 %v3606_v5 }
0x1b0b   :  { %1813 = vmatprep.subr.mxu1 %v4014_v1 }
0x1b0c   :  { %1814 = vmatpush1.msra.mxu1 %v4021_v2 }
0x1b0d   :  { %1815 = vmatprep.subr.mxu1 %v4028_v10 }
0x1b0e   :  { %1816 = vmatpush1.msra.mxu1 %v4035_v4 }
0x1b0f   :  { %1817 = vmatprep.subr.mxu1 %v4042_v11 }
0x1b10   :  { %1818 = vmatpush1.msra.mxu1 %v4049_v6 }
0x1b11   :  { %1819 = vmatprep.subr.mxu1 %v4056_v7 }
0x1b12   :  { %1820 = vmatpush1.msra.mxu1 %v4063_v12 }
0x1b13   :  { %1821 = vmatprep.subr.mxu1 %v4070_v14 }
0x1b14   :  { %1822 = vmatpush1.msra.mxu1 %v4078_v16 }
0x1b15   :  { %1823 = vmatprep.subr.mxu1 %v4084_v19 }
0x1b16   :  { %1824 = vmatpush1.msra.mxu1 %v4091_v20 }
0x1b17   :  { %1825 = vmatprep.subr.mxu1 %v4100_v23 }
0x1b18   :  { %1826 = vmatpush1.msra.mxu1 %v4108_v24 }
0x1b19   :  { %2003 = vmatprep.subr.mxu1 %v4004_v0 }
0x1bc9   :  { %v1669_v47 = vpop.f32.mrf.mxu1 }
0x1bca   :  { %v1674_v33 = vadd.f32 %v1669_v47, %v1292_v43 }
0x1bcb   :  { %v1671_v27 = vpop.f32.mrf.mxu1 }
0x1bcc   :  { %v1676_v18 = vmul.f32 0.5, %v1674_v33  ;;  %v1675_v17 = vadd.f32 %v1671_v27, %v1293_v48 }
0x1bce   :  { %3518 = vtanh.f32 %v1676_v18  ;;  %v1677_v37 = vmul.f32 0.5, %v1675_v17  ;;  %v1295_v18 = vadd.f32 %v4184_v41, %v1255_v61  ;;  %v1265_v61 = vadd.f32 %v4223_v58, %v4170_v46 }
0x1bcf   :  { %3520 = vtanh.f32 %v1675_v17 }
0x1bd0   :  { %3522 = vtanh.f32 %v1677_v37 }
0x1bdb   :  { %v3519_v63 = vpop.eup %3518 }
0x1bdc   :  { %v1680_v9 = vmul.f32 0.5, %v3519_v63  ;;  %v3521_v34 = vpop.eup %3520 }
0x1bdd   :  { %v3523_v50 = vpop.eup %3522 }
0x1bde   :  { %v1682_v0 = vadd.f32 0.5, %v1680_v9  ;;  %v1681_v15 = vmul.f32 0.5, %v3523_v50 }
0x1be0   :  { %v1686_v35 = vmul.f32 %v3521_v34, %v1682_v0  ;;  %v1685_v38 = vmul.f32 %v1682_v0, %v1595_v52  ;;  %v1683_v21 = vadd.f32 0.5, %v1681_v15  ;;  %v1253_v52 = vadd.f32 %v4215_v56, %v4162_v39 }
0x1be2   :  { %1688 = vrot.lane.b32.xlu0 %v1686_v35, %s3608_s30  ;;  %v1294_v32 = vadd.f32 %v4179_v53, %v1253_v52 }
0x1c54   :  { %v1689_v54 = vpop.permute.xlu0 %1688 }
0x1c55   :  { %v1691_v55 = vadd.f32 %v1689_v54, %v1685_v38 }
0x1c57   :  { %3524 = vtanh.f32 %v1691_v55 }
0x1c64   :  { %v3525_v28 = vpop.eup %3524 }
0x1c65   :  { %v4292_v26 = vmul.f32 %v3525_v28, %v1683_v21 }
0x1c67   :  { %1695 = vrot.lane.b32.xlu1 %v4292_v26, %s3608_s30 }
0x1cd9   :  { %v1696_v31 = vpop.permute.xlu1 %1695 }
0x1cda   :  { %3106 = vmatmul.mubr.msk.f32.vlgmr.msra.gmra.mxu0 %vm1307_vm4, %v1696_v31 }
0x1cdb   :  { %1908 = vmatpush1.msra.mxu0 %v4009_v8  ;;  %1955 = vmatprep.mubr.f32.mxu0 %v3606_v5 }
0x1cdc   :  { %1909 = vmatprep.subr.mxu0 %v4014_v1 }
0x1cdd   :  { %1910 = vmatpush1.msra.mxu0 %v4021_v2 }
0x1cde   :  { %1911 = vmatprep.subr.mxu0 %v4028_v10 }
0x1cdf   :  { %1912 = vmatpush1.msra.mxu0 %v4035_v4 }
0x1ce0   :  { %1913 = vmatprep.subr.mxu0 %v4042_v11 }
0x1ce1   :  { %1914 = vmatpush1.msra.mxu0 %v4049_v6 }
0x1ce2   :  { %1915 = vmatprep.subr.mxu0 %v4056_v7 }
0x1ce3   :  { %1916 = vmatpush1.msra.mxu0 %v4063_v12 }
0x1ce4   :  { %1917 = vmatprep.subr.mxu0 %v4070_v14 }
0x1ce5   :  { %1918 = vmatpush1.msra.mxu0 %v4078_v16 }
0x1ce6   :  { %1919 = vmatprep.subr.mxu0 %v4084_v19 }
0x1ce7   :  { %1920 = vmatpush1.msra.mxu0 %v4091_v20 }
0x1ce8   :  { %1921 = vmatprep.subr.mxu0 %v4100_v23 }
0x1ce9   :  { %1922 = vmatpush1.msra.mxu0 %v4108_v24 }
0x1d9a   :  { %v1765_v43 = vpop.f32.mrf.mxu0 }
0x1d9b   :  { %v1770_v47 = vadd.f32 %v1765_v43, %v1294_v32  ;;  %v1267_v32 = vadd.f32 %v4225_v59, %v4172_v49  ;;  %v1298_v43 = vadd.f32 %v4179_v53, %v1265_v61 }
0x1d9c   :  { %v1767_v33 = vpop.f32.mrf.mxu0 }
0x1d9d   :  { %v1772_v27 = vmul.f32 0.5, %v1770_v47  ;;  %v1771_v48 = vadd.f32 %v1767_v33, %v1295_v18 }
0x1d9f   :  { %3526 = vtanh.f32 %v1772_v27  ;;  %v1773_v39 = vmul.f32 0.5, %v1771_v48 }
0x1da0   :  { %3528 = vtanh.f32 %v1771_v48  ;;  %v1299_v48 = vadd.f32 %v4184_v41, %v1267_v32 }
0x1da1   :  { %3530 = vtanh.f32 %v1773_v39 }
0x1dac   :  { %v3527_v17 = vpop.eup %3526 }
0x1dad   :  { %v1776_v63 = vmul.f32 0.5, %v3527_v17  ;;  %v3529_v0 = vpop.eup %3528 }
0x1dae   :  { %v3531_v35 = vpop.eup %3530 }
0x1daf   :  { %v1778_v9 = vadd.f32 0.5, %v1776_v63  ;;  %v1777_v37 = vmul.f32 0.5, %v3531_v35 }
0x1db1   :  { %v1782_v34 = vmul.f32 %v3529_v0, %v1778_v9  ;;  %v1781_v40 = vmul.f32 %v1778_v9, %v1691_v55  ;;  %v1779_v38 = vadd.f32 0.5, %v1777_v37 }
0x1db3   :  { %1784 = vrot.lane.b32.xlu0 %v1782_v34, %s3608_s30 }
0x1e25   :  { %v1785_v56 = vpop.permute.xlu0 %1784 }
0x1e26   :  { %v1787_v22 = vadd.f32 %v1785_v56, %v1781_v40 }
0x1e28   :  { %3532 = vtanh.f32 %v1787_v22 }
0x1e35   :  { %v3533_v54 = vpop.eup %3532 }
0x1e36   :  { %v4320_v50 = vmul.f32 %v3533_v54, %v1779_v38 }
0x1e38   :  { %1791 = vrot.lane.b32.xlu1 %v4320_v50, %s3608_s30 }
0x1eaa   :  { %v1792_v15 = vpop.permute.xlu1 %1791 }
0x1eab   :  { %3107 = vmatmul.mubr.msk.f32.vlgmr.msra.gmra.mxu1 %vm1307_vm4, %v1792_v15  ;;  %v2081_v15 = vld [vmem:[%s4652_s9 + $0x18] sm:$0xff] }
0x1eac   :  { %2004 = vmatpush1.msra.mxu1 %v4009_v8  ;;  %2051 = vmatprep.mubr.f32.mxu1 %v3606_v5  ;;  %v1259_v8 = vadd.f32 %v4219_v13, %v4166_v42 }
0x1ead   :  { %2005 = vmatprep.subr.mxu1 %v4014_v1  ;;  %v1261_v1 = vadd.f32 %v4221_v57, %v4168_v44  ;;  %3330 = vmatprep.subr.mxu0 %v2081_v15 }
0x1eae   :  { %2006 = vmatpush1.msra.mxu1 %v4021_v2  ;;  %v1296_v2 = vadd.f32 %v4179_v53, %v1259_v8  ;;  %v2080_v8 = vld [vmem:[%s4652_s9 + $0x10] sm:$0xff] }
0x1eaf   :  { %2007 = vmatprep.subr.mxu1 %v4028_v10 }
0x1eb0   :  { %2008 = vmatpush1.msra.mxu1 %v4035_v4 }
0x1eb1   :  { %2009 = vmatprep.subr.mxu1 %v4042_v11 }
0x1eb2   :  { %2010 = vmatpush1.msra.mxu1 %v4049_v6 }
0x1eb3   :  { %2011 = vmatprep.subr.mxu1 %v4056_v7  ;;  %v1297_v7 = vadd.f32 %v4184_v41, %v1261_v1  ;;  %v1273_v1 = vadd.f32 %v4230_v3, %v4181_v36 }
0x1eb4   :  { %2012 = vmatpush1.msra.mxu1 %v4063_v12 }
0x1eb5   :  { %2013 = vmatprep.subr.mxu1 %v4070_v14 }
0x1eb6   :  { %2014 = vmatpush1.msra.mxu1 %v4078_v16 }
0x1eb7   :  { %2015 = vmatprep.subr.mxu1 %v4084_v19 }
0x1eb8   :  { %2016 = vmatpush1.msra.mxu1 %v4091_v20 }
0x1eb9   :  { %2017 = vmatprep.subr.mxu1 %v4100_v23 }
0x1eba   :  { %2018 = vmatpush1.msra.mxu1 %v4108_v24 }
0x1ebb   :  { %3350 = vmatprep.subr.mxu1 %v3606_v5 }
0x1f6b   :  { %v1861_v10 = vpop.f32.mrf.mxu1 }
0x1f6c   :  { %v1866_v4 = vadd.f32 %v1861_v10, %v1296_v2 }
0x1f6d   :  { %v1863_v11 = vpop.f32.mrf.mxu1 }
0x1f6e   :  { %v1868_v6 = vmul.f32 0.5, %v1866_v4  ;;  %v1867_v12 = vadd.f32 %v1863_v11, %v1297_v7  ;;  %v1301_v7 = vadd.f32 %v4184_v41, %v1273_v1 }
0x1f70   :  { %3534 = vtanh.f32 %v1868_v6  ;;  %v1869_v24 = vmul.f32 0.5, %v1867_v12 }
0x1f71   :  { %3536 = vtanh.f32 %v1867_v12 }
0x1f72   :  { %3538 = vtanh.f32 %v1869_v24 }
0x1f7d   :  { %v3535_v14 = vpop.eup %3534 }
0x1f7e   :  { %v1872_v16 = vmul.f32 0.5, %v3535_v14  ;;  %v3537_v20 = vpop.eup %3536  ;;  %v2079_v14 = vld [vmem:[%s4652_s9 + $0x8] sm:$0xff] }
0x1f7f   :  { %v3539_v57 = vpop.eup %3538 }
0x1f80   :  { %v1874_v19 = vadd.f32 0.5, %v1872_v16  ;;  %v1873_v55 = vmul.f32 0.5, %v3539_v57  ;;  %v4396_v16 = vld [vmem:[%s4653_s10 + $0x18] sm:$0xff] }
0x1f82   :  { %v1878_v23 = vmul.f32 %v3537_v20, %v1874_v19  ;;  %v1877_v42 = vmul.f32 %v1874_v19, %v1787_v22  ;;  %v1875_v21 = vadd.f32 0.5, %v1873_v55  ;;  %v4401_v19 = vld [vmem:[%s4653_s10 + $0x10] sm:$0xff]  ;;  %v4408_v20 = vld [vmem:[%s4653_s10 + $0x8] sm:$0xff] }
0x1f84   :  { %1880 = vrot.lane.b32.xlu0 %v1878_v23, %s3608_s30 }
0x1ff6   :  { %v1881_v44 = vpop.permute.xlu0 %1880 }
0x1ff7   :  { %v1883_v13 = vadd.f32 %v1881_v44, %v1877_v42 }
0x1ff9   :  { %3540 = vtanh.f32 %v1883_v13 }
0x2006   :  { %v3541_v28 = vpop.eup %3540 }
0x2007   :  { %v4349_v31 = vmul.f32 %v3541_v28, %v1875_v21 }
0x2009   :  { %1887 = vrot.lane.b32.xlu1 %v4349_v31, %s3608_s30 }
0x207b   :  { %v1888_v52 = vpop.permute.xlu1 %1887 }
0x207c   :  { %3108 = vmatmul.mubr.msk.f32.vlgmr.msra.gmra.mxu0 %vm1307_vm4, %v1888_v52 }
0x207d   :  { %3331 = vmatpush3.msra.mxu0 %v2081_v15 }
0x207e   :  { %3332 = vmatprep.subr.mxu0 %v2080_v8 }
0x207f   :  { %3333 = vmatpush3.msra.mxu0 %v2080_v8 }
0x2080   :  { %3334 = vmatprep.subr.mxu0 %v2079_v14 }
0x2081   :  { %3335 = vmatpush3.msra.mxu0 %v2079_v14 }
0x213c   :  { %v1957_v47 = vpop.f32.mrf.mxu0 }
0x213d   :  { %v1962_v33 = vadd.f32 %v1957_v47, %v1298_v43  ;;  %v4455_v47 = vld [vmem:[%s4654_s11] ss:$0 sm:$0xff] }
0x213e   :  { %v1959_v27 = vpop.f32.mrf.mxu0 }
0x213f   :  { %v1964_v18 = vmul.f32 0.5, %v1962_v33  ;;  %v1963_v17 = vadd.f32 %v1959_v27, %v1299_v48 }
0x2141   :  { %3542 = vtanh.f32 %v1964_v18  ;;  %v1965_v46 = vmul.f32 0.5, %v1963_v17 }
0x2142   :  { %3544 = vtanh.f32 %v1963_v17 }
0x2143   :  { %3546 = vtanh.f32 %v1965_v46 }
0x214e   :  { %v3543_v63 = vpop.eup %3542 }
0x214f   :  { %v1968_v9 = vmul.f32 0.5, %v3543_v63  ;;  %v3545_v34 = vpop.eup %3544 }
0x2150   :  { %v3547_v40 = vpop.eup %3546 }
0x2151   :  { %v1970_v0 = vadd.f32 0.5, %v1968_v9  ;;  %v1969_v56 = vmul.f32 0.5, %v3547_v40 }
0x2153   :  { %v1974_v39 = vmul.f32 %v3545_v34, %v1970_v0  ;;  %v1973_v49 = vmul.f32 %v1970_v0, %v1883_v13  ;;  %v1971_v22 = vadd.f32 0.5, %v1969_v56 }
0x2155   :  { %1976 = vrot.lane.b32.xlu0 %v1974_v39, %s3608_s30 }
0x21c7   :  { %v1977_v58 = vpop.permute.xlu0 %1976 }
0x21c8   :  { %v1979_v59 = vadd.f32 %v1977_v58, %v1973_v49 }
0x21ca   :  { %3548 = vtanh.f32 %v1979_v59 }
0x21d7   :  { %v3549_v35 = vpop.eup %3548 }
0x21d8   :  { %v4361_v37 = vmul.f32 %v3549_v35, %v1971_v22 }
0x21da   :  { %1983 = vrot.lane.b32.xlu1 %v4361_v37, %s3608_s30 }
0x21de   :  { %2090 = vrot.lane.b32.xlu1 %v4189_v45, %s3609_s4  ;;  %v1271_v45 = vadd.f32 %v4227_v60, %v4177_v51  ;;  %v2078_v51 = vld [vmem:[%s4652_s9] sm:$0xff] }
0x21df   :  { %3336 = vmatprep.subr.mxu0 %v2078_v51 }
0x21e0   :  { %v1300_v2 = vadd.f32 %v4179_v53, %v1271_v45  ;;  %3337 = vmatpush3.msra.mxu0 %v2078_v51 }
0x21e1   :  { %3361 = vmatprep.subr.mxu0 %v3606_v5 }
0x224c   :  { %v1984_v38 = vpop.permute.xlu1 %1983 }
0x224d   :  { %3109 = vmatmul.mubr.msk.f32.vlgmr.msra.gmra.mxu1 %vm1307_vm4, %v1984_v38 }
0x224e   :  { %3358 = vmatprep.mubr.msk.f32.mxu1 %vm3607_vm2, %v3606_v5  ;;  %3351 = vmatpush3.msra.mxu1 %v4396_v16 }
0x224f   :  { %3352 = vmatprep.subr.mxu1 %v3606_v5 }
0x2250   :  { %v2091_v54 = vpop.permute.xlu1 %2090  ;;  %3353 = vmatpush3.msra.mxu1 %v4401_v19 }
0x2251   :  { %3338 = vmatprep.mubr.msk.f32.mxu0 %vm197_vm3, %v2091_v54  ;;  %3354 = vmatprep.subr.mxu1 %v3606_v5 }
0x2252   :  { %3355 = vmatpush3.msra.mxu1 %v4408_v20 }
0x2253   :  { %3356 = vmatprep.subr.mxu1 %v3606_v5 }
0x230d   :  { %v2053_v10 = vpop.f32.mrf.mxu1 }
0x230e   :  { %v2058_v4 = vadd.f32 %v2053_v10, %v1300_v2 }
0x230f   :  { %v2055_v11 = vpop.f32.mrf.mxu1 }
0x2310   :  { %v2060_v6 = vmul.f32 0.5, %v2058_v4  ;;  %v2059_v12 = vadd.f32 %v2055_v11, %v1301_v7 }
0x2312   :  { %3550 = vtanh.f32 %v2060_v6  ;;  %v2061_v23 = vmul.f32 0.5, %v2059_v12 }
0x2313   :  { %3552 = vtanh.f32 %v2059_v12 }
0x2314   :  { %3554 = vtanh.f32 %v2061_v23 }
0x231f   :  { %v3551_v53 = vpop.eup %3550 }
0x2320   :  { %v2064_v36 = vmul.f32 0.5, %v3551_v53  ;;  %v3553_v60 = vpop.eup %3552 }
0x2321   :  { %v3555_v57 = vpop.eup %3554 }
0x2322   :  { %v2066_v41 = vadd.f32 0.5, %v2064_v36  ;;  %v2065_v55 = vmul.f32 0.5, %v3555_v57 }
0x2324   :  { %v2070_v3 = vmul.f32 %v3553_v60, %v2066_v41  ;;  %v2069_v24 = vmul.f32 %v2066_v41, %v1979_v59  ;;  %v2067_v21 = vadd.f32 0.5, %v2065_v55 }
0x2326   :  { %2072 = vrot.lane.b32.xlu0 %v2070_v3, %s3608_s30 }
0x232a   :  { %2092 = vrot.lane.b32.xlu0 %v4236_v25, %s3609_s4  ;;  %v4415_v25 = vld [vmem:[%s4653_s10] sm:$0xff]  ;;  %s3610_s10 = smov 96  }
0x232b   :  { %3357 = vmatpush3.msra.mxu1 %v4415_v25 }
0x232c   :  { %3372 = vmatprep.subr.mxu1 %v3606_v5 }
0x2398   :  { %v2073_v42 = vpop.permute.xlu0 %2072 }
0x2399   :  { %v4421_v44 = vadd.f32 %v2073_v42, %v2069_v24 }
0x239b   :  { %3556 = vtanh.f32 %v4421_v44 }
0x239c   :  { %v2093_v13 = vpop.permute.xlu0 %2092 }
0x239d   :  { %3339 = vmatmul.mubr.msk.f32.vlgmr.msra.gmra.mxu0 %vm197_vm3, %v2093_v13 }
0x239e   :  { %3362 = vmatpush3.msra.mxu0 %v4396_v16 }
0x239f   :  { %3363 = vmatprep.subr.mxu0 %v3606_v5 }
0x23a0   :  { %3364 = vmatpush3.msra.mxu0 %v4401_v19 }
0x23a1   :  { %3365 = vmatprep.subr.mxu0 %v3606_v5 }
0x23a2   :  { %3366 = vmatpush3.msra.mxu0 %v4408_v20 }
0x23a3   :  { %3367 = vmatprep.subr.mxu0 %v3606_v5 }
0x23a4   :  { %3368 = vmatpush3.msra.mxu0 %v4415_v25 }
0x23a5   :  { %3383 = vmatprep.subr.mxu0 %v3606_v5 }
0x23a8   :  { %v3557_v28 = vpop.eup %3556 }
0x23a9   :  { %v4433_v52 = vmul.f32 %v3557_v28, %v2067_v21 }
0x23ab   :  { %2231 = vrot.lane.b32.xlu1 %v4433_v52, %s3608_s30 }
0x23af   :  { %2312 = vrot.lane.b32.xlu1 %v4421_v44, %s3610_s10 }
0x241d   :  { %v2232_v61 = vpop.permute.xlu1 %2231 }
0x241e   :  { %3359 = vmatmul.mubr.msk.f32.vlgmr.msra.gmra.mxu1 %vm197_vm3, %v2232_v61 }
0x241f   :  { %3373 = vmatpush3.msra.mxu1 %v4396_v16  ;;  %3380 = vmatprep.mubr.msk.f32.mxu1 %vm3607_vm2, %v3606_v5 }
0x2420   :  { %3374 = vmatprep.subr.mxu1 %v3606_v5 }
0x2421   :  { %3375 = vmatpush3.msra.mxu1 %v4401_v19  ;;  %v2313_v49 = vpop.permute.xlu1 %2312 }
0x2422   :  { %3376 = vmatprep.subr.mxu1 %v3606_v5 }
0x2423   :  { %3377 = vmatpush3.msra.mxu1 %v4408_v20 }
0x2424   :  { %3378 = vmatprep.subr.mxu1 %v3606_v5 }
0x2425   :  { %3379 = vmatpush3.msra.mxu1 %v4415_v25 }
0x2426   :  { %3394 = vmatprep.subr.mxu1 %v3606_v5 }
0x245d   :  { %v4450_v32 = vpop.f32.mrf.mxu0 }
0x245e   :  { %v2194_v4 = vadd.f32 %v4450_v32, %v4455_v47 }
0x245f   :  { %v2188_v43 = vpop.f32.mrf.mxu0 }
0x2460   :  { %v2189_v33 = vadd.f32 %v4455_v47, %v2188_v43 }
0x24de   :  { %v2301_v27 = vpop.f32.mrf.mxu1 }
0x24df   :  { %v2305_v18 = vadd.f32 %v2301_v27, %v2189_v33 }
0x24e0   :  { %v3360_v48 = vpop.f32.mrf.mxu1 }
0x24e1   :  { %3558 = vtanh.f32 %v2305_v18  ;;  %v2306_v63 = vmul.f32 0.5, %v2305_v18 }
0x24e3   :  { %3560 = vtanh.f32 %v2306_v63 }
0x24ee   :  { %v3559_v17 = vpop.eup %3558 }
0x24ef   :  { %2317 = vrot.lane.b32.xlu0 %v3559_v17, %s3608_s30 }
0x24f0   :  { %v3561_v9 = vpop.eup %3560 }
0x24f1   :  { %v2308_v0 = vmul.f32 0.5, %v3561_v9 }
0x24f3   :  { %v2309_v34 = vadd.f32 0.5, %v2308_v0 }
0x24f5   :  { %v2315_v58 = vmul.f32 %v2313_v49, %v2309_v34 }
0x2561   :  { %v2318_v39 = vpop.permute.xlu0 %2317 }
0x2562   :  { %v2320_v46 = vmul.f32 %v2318_v39, %v2309_v34 }
0x2564   :  { %2322 = vrot.lane.b32.xlu0 %v2320_v46, %s3609_s4 }
0x2568   :  { %2094 = vrot.lane.b32.xlu0 %v4263_v30, %s3609_s4 }
0x256c   :  { %2098 = vrot.lane.b32.xlu0 %v4320_v50, %s3609_s4 }
0x2570   :  { %2102 = vrot.lane.b32.xlu0 %v4361_v37, %s3609_s4 }
0x25d6   :  { %v2323_v59 = vpop.permute.xlu0 %2322 }
0x25d7   :  { %v2325_v40 = vadd.f32 %v2323_v59, %v2315_v58 }
0x25d9   :  { %3562 = vtanh.f32 %v2325_v40 }
0x25da   :  { %v2095_v56 = vpop.permute.xlu0 %2094 }
0x25db   :  { %3341 = vmatprep.mubr.msk.f32.mxu0 %vm197_vm3, %v2095_v56 }
0x25de   :  { %v2099_v35 = vpop.permute.xlu0 %2098 }
0x25e2   :  { %v2103_v54 = vpop.permute.xlu0 %2102 }
0x25e6   :  { %v3563_v22 = vpop.eup %3562 }
0x25e7   :  { %2328 = vrot.lane.b32.xlu1 %v3563_v22, %s3608_s30 }
0x25eb   :  { %2096 = vrot.lane.b32.xlu1 %v4292_v26, %s3609_s4 }
0x25ef   :  { %2100 = vrot.lane.b32.xlu1 %v4349_v31, %s3609_s4 }
0x25f3   :  { %2104 = vrot.lane.b32.xlu1 %v4433_v52, %s3609_s4 }
0x2659   :  { %v2329_v30 = vpop.permute.xlu1 %2328 }
0x265a   :  { %v2331_v50 = vmul.f32 %v2329_v30, %v2309_v34 }
0x265c   :  { %2333 = vrot.lane.b32.xlu0 %v2331_v50, %s3609_s4 }
0x265d   :  { %v2097_v37 = vpop.permute.xlu1 %2096 }
0x265e   :  { %3342 = vmatmul.mubr.msk.f32.gmra.mxu0 %vm197_vm3, %v2097_v37 }
0x265f   :  { %3344 = vmatprep.mubr.msk.f32.mxu0 %vm197_vm3, %v2099_v35 }
0x2661   :  { %v2101_v38 = vpop.permute.xlu1 %2100 }
0x2662   :  { %3345 = vmatmul.mubr.msk.f32.gmra.mxu0 %vm197_vm3, %v2101_v38 }
0x2663   :  { %3347 = vmatprep.mubr.msk.f32.mxu0 %vm197_vm3, %v2103_v54 }
0x2665   :  { %v2105_v26 = vpop.permute.xlu1 %2104 }
0x2666   :  { %3348 = vmatmul.mubr.msk.f32.gmra.mxu0 %vm197_vm3, %v2105_v26 }
0x2667   :  { %3369 = vmatprep.mubr.msk.f32.mxu0 %vm3607_vm2, %v3606_v5 }
0x26ce   :  { %v2334_v31 = vpop.permute.xlu0 %2333 }
0x26cf   :  { %2336 = vst.msk [vmem:[%s4655_s13] sm:$0xff] %vm197_vm3, %v2334_v31  ;;  %3370 = vmatmul.mubr.msk.f32.vlgmr.msra.gmra.mxu0 %vm197_vm3, %v2334_v31 }
0x26d0   :  { %3384 = vmatpush3.msra.mxu0 %v4396_v16  ;;  %3391 = vmatprep.mubr.msk.f32.mxu0 %vm3607_vm2, %v3606_v5 }
0x26d1   :  { %3385 = vmatprep.subr.mxu0 %v3606_v5 }
0x26d2   :  { %3386 = vmatpush3.msra.mxu0 %v4401_v19 }
0x26d3   :  { %3387 = vmatprep.subr.mxu0 %v3606_v5 }
0x26d4   :  { %3388 = vmatpush3.msra.mxu0 %v4408_v20 }
0x26d5   :  { %3389 = vmatprep.subr.mxu0 %v3606_v5 }
0x26d6   :  { %3390 = vmatpush3.msra.mxu0 %v4415_v25 }
0x26d7   :  { %3405 = vmatprep.subr.mxu0 %v3606_v5 }
0x271e   :  { %v4497_v15 = vpop.f32.mrf.mxu0 }
0x271f   :  { %v2204_v59 = vadd.f32 %v4497_v15, %v4455_v47 }
0x2720   :  { %v2198_v8 = vpop.f32.mrf.mxu0 }
0x2721   :  { %v2199_v21 = vadd.f32 %v4455_v47, %v2198_v8 }
0x2722   :  { %v4499_v45 = vpop.f32.mrf.mxu0 }
0x2724   :  { %v4501_v1 = vpop.f32.mrf.mxu0 }
0x2726   :  { %v4503_v2 = vpop.f32.mrf.mxu0 }
0x2728   :  { %v4505_v10 = vpop.f32.mrf.mxu0 }
0x278f   :  { %v2405_v11 = vpop.f32.mrf.mxu0 }
0x2790   :  { %v2409_v6 = vadd.f32 %v2405_v11, %v2194_v4 }
0x2791   :  { %v3371_v7 = vpop.f32.mrf.mxu0 }
0x2792   :  { %3564 = vtanh.f32 %v2409_v6  ;;  %v2410_v14 = vmul.f32 0.5, %v2409_v6 }
0x2794   :  { %3566 = vtanh.f32 %v2410_v14 }
0x279f   :  { %v3565_v12 = vpop.eup %3564 }
0x27a0   :  { %2417 = vrot.lane.b32.xlu1 %v3565_v12, %s3608_s30  ;;  %v2209_v12 = vadd.f32 %v4455_v47, %v4501_v1 }
0x27a1   :  { %v3567_v51 = vpop.eup %3566 }
0x27a2   :  { %v2412_v53 = vmul.f32 0.5, %v3567_v51 }
0x27a4   :  { %v2413_v36 = vadd.f32 0.5, %v2412_v53 }
0x27a6   :  { %v2415_v3 = vmul.f32 %v2413_v36, %v2325_v40 }
0x2812   :  { %v2418_v41 = vpop.permute.xlu1 %2417 }
0x2813   :  { %v2420_v60 = vmul.f32 %v2418_v41, %v2413_v36 }
0x2815   :  { %2422 = vrot.lane.b32.xlu0 %v2420_v60, %s3609_s4 }
0x2887   :  { %v2423_v23 = vpop.permute.xlu0 %2422 }
0x2888   :  { %v2425_v24 = vadd.f32 %v2423_v23, %v2415_v3 }
0x288a   :  { %3568 = vtanh.f32 %v2425_v24 }
0x2897   :  { %v3569_v42 = vpop.eup %3568 }
0x2898   :  { %2428 = vrot.lane.b32.xlu1 %v3569_v42, %s3608_s30 }
0x290a   :  { %v2429_v13 = vpop.permute.xlu1 %2428 }
0x290b   :  { %v4512_v57 = vmul.f32 %v2429_v13, %v2413_v36 }
0x290d   :  { %2438 = vrot.lane.b32.xlu0 %v4512_v57, %s3609_s4 }
0x297f   :  { %v2439_v55 = vpop.permute.xlu0 %2438 }
0x2980   :  { %3381 = vmatmul.mubr.msk.f32.vlgmr.msra.gmra.mxu1 %vm197_vm3, %v2439_v55 }
0x2981   :  { %3395 = vmatpush3.msra.mxu1 %v4396_v16  ;;  %3402 = vmatprep.mubr.msk.f32.mxu1 %vm3607_vm2, %v3606_v5 }
0x2982   :  { %3396 = vmatprep.subr.mxu1 %v3606_v5 }
0x2983   :  { %3397 = vmatpush3.msra.mxu1 %v4401_v19 }
0x2984   :  { %3398 = vmatprep.subr.mxu1 %v3606_v5 }
0x2985   :  { %3399 = vmatpush3.msra.mxu1 %v4408_v20 }
0x2986   :  { %3400 = vmatprep.subr.mxu1 %v3606_v5 }
0x2987   :  { %3401 = vmatpush3.msra.mxu1 %v4415_v25 }
0x2988   :  { %3416 = vmatprep.subr.mxu1 %v3606_v5 }
0x2a40   :  { %v2508_v28 = vpop.f32.mrf.mxu1 }
0x2a41   :  { %v2512_v61 = vadd.f32 %v2508_v28, %v2199_v21 }
0x2a42   :  { %v3382_v32 = vpop.f32.mrf.mxu1 }
0x2a43   :  { %3570 = vtanh.f32 %v2512_v61  ;;  %v2513_v33 = vmul.f32 0.5, %v2512_v61 }
0x2a45   :  { %3572 = vtanh.f32 %v2513_v33 }
0x2a50   :  { %v3571_v43 = vpop.eup %3570 }
0x2a51   :  { %2520 = vrot.lane.b32.xlu1 %v3571_v43, %s3608_s30  ;;  %v2214_v43 = vadd.f32 %v4499_v45, %v4455_v47 }
0x2a52   :  { %v3573_v27 = vpop.eup %3572 }
0x2a53   :  { %v2515_v18 = vmul.f32 0.5, %v3573_v27 }
0x2a55   :  { %v2516_v48 = vadd.f32 0.5, %v2515_v18 }
0x2a57   :  { %v2518_v9 = vmul.f32 %v2516_v48, %v2425_v24 }
0x2ac3   :  { %v2521_v17 = vpop.permute.xlu1 %2520 }
0x2ac4   :  { %v2523_v63 = vmul.f32 %v2521_v17, %v2516_v48 }
0x2ac6   :  { %2525 = vrot.lane.b32.xlu0 %v2523_v63, %s3609_s4 }
0x2b38   :  { %v2526_v0 = vpop.permute.xlu0 %2525 }
0x2b39   :  { %v2528_v34 = vadd.f32 %v2526_v0, %v2518_v9 }
0x2b3b   :  { %3574 = vtanh.f32 %v2528_v34 }
0x2b48   :  { %v3575_v39 = vpop.eup %3574 }
0x2b49   :  { %2531 = vrot.lane.b32.xlu1 %v3575_v39, %s3608_s30 }
0x2bbb   :  { %v2532_v46 = vpop.permute.xlu1 %2531 }
0x2bbc   :  { %v4531_v49 = vmul.f32 %v2532_v46, %v2516_v48 }
0x2bbe   :  { %2541 = vrot.lane.b32.xlu0 %v4531_v49, %s3609_s4 }
0x2c30   :  { %v2542_v58 = vpop.permute.xlu0 %2541 }
0x2c31   :  { %3392 = vmatmul.mubr.msk.f32.vlgmr.msra.gmra.mxu0 %vm197_vm3, %v2542_v58  ;;  %v2219_v58 = vadd.f32 %v4455_v47, %v4505_v10 }
0x2c32   :  { %3406 = vmatpush3.msra.mxu0 %v4396_v16  ;;  %3413 = vmatprep.mubr.msk.f32.mxu0 %vm3607_vm2, %v3606_v5 }
0x2c33   :  { %3407 = vmatprep.subr.mxu0 %v3606_v5 }
0x2c34   :  { %3408 = vmatpush3.msra.mxu0 %v4401_v19 }
0x2c35   :  { %3409 = vmatprep.subr.mxu0 %v3606_v5 }
0x2c36   :  { %3410 = vmatpush3.msra.mxu0 %v4408_v20 }
0x2c37   :  { %3411 = vmatprep.subr.mxu0 %v3606_v5 }
0x2c38   :  { %3412 = vmatpush3.msra.mxu0 %v4415_v25 }
0x2c39   :  { %3427 = vmatprep.subr.mxu0 %v3606_v5 }
0x2cf1   :  { %v2611_v40 = vpop.f32.mrf.mxu0 }
0x2cf2   :  { %v2615_v56 = vadd.f32 %v2611_v40, %v2204_v59 }
0x2cf3   :  { %v3393_v22 = vpop.f32.mrf.mxu0 }
0x2cf4   :  { %3576 = vtanh.f32 %v2615_v56  ;;  %v2616_v50 = vmul.f32 0.5, %v2615_v56 }
0x2cf6   :  { %3578 = vtanh.f32 %v2616_v50 }
0x2d01   :  { %v3577_v30 = vpop.eup %3576 }
0x2d02   :  { %2623 = vrot.lane.b32.xlu1 %v3577_v30, %s3608_s30 }
0x2d03   :  { %v3579_v35 = vpop.eup %3578 }
0x2d04   :  { %v2618_v37 = vmul.f32 0.5, %v3579_v35 }
0x2d06   :  { %v2619_v38 = vadd.f32 0.5, %v2618_v37 }
0x2d08   :  { %v2621_v31 = vmul.f32 %v2619_v38, %v2528_v34 }
0x2d74   :  { %v2624_v54 = vpop.permute.xlu1 %2623 }
0x2d75   :  { %v2626_v26 = vmul.f32 %v2624_v54, %v2619_v38 }
0x2d77   :  { %2628 = vrot.lane.b32.xlu0 %v2626_v26, %s3609_s4 }
0x2de9   :  { %v2629_v8 = vpop.permute.xlu0 %2628 }
0x2dea   :  { %v2631_v4 = vadd.f32 %v2629_v8, %v2621_v31 }
0x2dec   :  { %3580 = vtanh.f32 %v2631_v4 }
0x2df9   :  { %v3581_v15 = vpop.eup %3580 }
0x2dfa   :  { %2634 = vrot.lane.b32.xlu1 %v3581_v15, %s3608_s30 }
0x2e6c   :  { %v2635_v11 = vpop.permute.xlu1 %2634 }
0x2e6d   :  { %v4551_v6 = vmul.f32 %v2635_v11, %v2619_v38 }
0x2e6f   :  { %2641 = vrot.lane.b32.xlu0 %v4551_v6, %s3609_s4 }
0x2ee1   :  { %v2642_v7 = vpop.permute.xlu0 %2641 }
0x2ee2   :  { %3403 = vmatmul.mubr.msk.f32.vlgmr.msra.gmra.mxu1 %vm197_vm3, %v2642_v7  ;;  %v2224_v7 = vadd.f32 %v4503_v2, %v4455_v47 }
0x2ee3   :  { %3417 = vmatpush3.msra.mxu1 %v4396_v16  ;;  %3424 = vmatprep.mubr.msk.f32.mxu1 %vm3607_vm2, %v3606_v5 }
0x2ee4   :  { %3418 = vmatprep.subr.mxu1 %v3606_v5 }
0x2ee5   :  { %3419 = vmatpush3.msra.mxu1 %v4401_v19 }
0x2ee6   :  { %3420 = vmatprep.subr.mxu1 %v3606_v5 }
0x2ee7   :  { %3421 = vmatpush3.msra.mxu1 %v4408_v20 }
0x2ee8   :  { %3422 = vmatprep.subr.mxu1 %v3606_v5 }
0x2ee9   :  { %3423 = vmatpush3.msra.mxu1 %v4415_v25 }
0x2fa2   :  { %v2711_v14 = vpop.f32.mrf.mxu1 }
0x2fa3   :  { %v2715_v51 = vadd.f32 %v2711_v14, %v2209_v12 }
0x2fa4   :  { %v3404_v53 = vpop.f32.mrf.mxu1 }
0x2fa5   :  { %3582 = vtanh.f32 %v2715_v51  ;;  %v2716_v41 = vmul.f32 0.5, %v2715_v51 }
0x2fa7   :  { %3584 = vtanh.f32 %v2716_v41 }
0x2fb2   :  { %v3583_v36 = vpop.eup %3582 }
0x2fb3   :  { %2723 = vrot.lane.b32.xlu1 %v3583_v36, %s3608_s30 }
0x2fb4   :  { %v3585_v60 = vpop.eup %3584 }
0x2fb5   :  { %v2718_v3 = vmul.f32 0.5, %v3585_v60 }
0x2fb7   :  { %v2719_v23 = vadd.f32 0.5, %v2718_v3 }
0x2fb9   :  { %v2721_v13 = vmul.f32 %v2719_v23, %v2631_v4 }
0x3025   :  { %v2724_v24 = vpop.permute.xlu1 %2723 }
0x3026   :  { %v2726_v42 = vmul.f32 %v2724_v24, %v2719_v23 }
0x3028   :  { %2728 = vrot.lane.b32.xlu0 %v2726_v42, %s3609_s4 }
0x309a   :  { %v2729_v55 = vpop.permute.xlu0 %2728 }
0x309b   :  { %v2731_v21 = vadd.f32 %v2729_v55, %v2721_v13 }
0x309d   :  { %3586 = vtanh.f32 %v2731_v21 }
0x30aa   :  { %v3587_v1 = vpop.eup %3586 }
0x30ab   :  { %2734 = vrot.lane.b32.xlu1 %v3587_v1, %s3608_s30 }
0x311d   :  { %v2735_v28 = vpop.permute.xlu1 %2734 }
0x311e   :  { %v2737_v61 = vmul.f32 %v2735_v28, %v2719_v23 }
0x3120   :  { %2739 = vrot.lane.b32.xlu0 %v2737_v61, %s3609_s4 }
0x3192   :  { %v2740_v32 = vpop.permute.xlu0 %2739 }
0x3193   :  { %2742 = vst.msk [vmem:[%s4655_s13 + $0x8] sm:$0xff] %vm197_vm3, %v2740_v32  ;;  %3414 = vmatmul.mubr.msk.f32.vlgmr.msra.gmra.mxu0 %vm197_vm3, %v2740_v32 }
0x3194   :  { %3428 = vmatpush3.msra.mxu0 %v4396_v16  ;;  %3435 = vmatprep.mubr.msk.f32.mxu0 %vm3607_vm2, %v3606_v5 }
0x3195   :  { %3429 = vmatprep.subr.mxu0 %v3606_v5 }
0x3196   :  { %3430 = vmatpush3.msra.mxu0 %v4401_v19 }
0x3197   :  { %3431 = vmatprep.subr.mxu0 %v3606_v5 }
0x3198   :  { %3432 = vmatpush3.msra.mxu0 %v4408_v20 }
0x3199   :  { %3433 = vmatprep.subr.mxu0 %v3606_v5 }
0x319a   :  { %3434 = vmatpush3.msra.mxu0 %v4415_v25 }
0x3253   :  { %v2811_v33 = vpop.f32.mrf.mxu0 }
0x3254   :  { %v2815_v16 = vadd.f32 %v2811_v33, %v2214_v43 }
0x3255   :  { %v3415_v27 = vpop.f32.mrf.mxu0 }
0x3256   :  { %3588 = vtanh.f32 %v2815_v16  ;;  %v2816_v48 = vmul.f32 0.5, %v2815_v16 }
0x3258   :  { %3590 = vtanh.f32 %v2816_v48 }
0x3263   :  { %v3589_v18 = vpop.eup %3588 }
0x3264   :  { %2823 = vrot.lane.b32.xlu1 %v3589_v18, %s3608_s30 }
0x3265   :  { %v3591_v19 = vpop.eup %3590 }
0x3266   :  { %v2818_v17 = vmul.f32 0.5, %v3591_v19 }
0x3268   :  { %v2819_v63 = vadd.f32 0.5, %v2818_v17 }
0x326a   :  { %v2821_v5 = vmul.f32 %v2819_v63, %v2731_v21 }
0x32d6   :  { %v2824_v20 = vpop.permute.xlu1 %2823 }
0x32d7   :  { %v2826_v9 = vmul.f32 %v2824_v20, %v2819_v63 }
0x32d9   :  { %2828 = vrot.lane.b32.xlu0 %v2826_v9, %s3609_s4 }
0x334b   :  { %v2829_v25 = vpop.permute.xlu0 %2828 }
0x334c   :  { %v2831_v0 = vadd.f32 %v2829_v25, %v2821_v5 }
0x334e   :  { %3592 = vtanh.f32 %v2831_v0 }
0x335b   :  { %v3593_v45 = vpop.eup %3592 }
0x335c   :  { %2834 = vrot.lane.b32.xlu1 %v3593_v45, %s3608_s30 }
0x33ce   :  { %v2835_v34 = vpop.permute.xlu1 %2834 }
0x33cf   :  { %v2837_v39 = vmul.f32 %v2835_v34, %v2819_v63 }
0x33d1   :  { %2843 = vrot.lane.b32.xlu0 %v2837_v39, %s3609_s4 }
0x3443   :  { %v2844_v46 = vpop.permute.xlu0 %2843 }
0x3444   :  { %3425 = vmatmul.mubr.msk.f32.vlgmr.msra.gmra.mxu1 %vm197_vm3, %v2844_v46 }
0x3504   :  { %v2913_v59 = vpop.f32.mrf.mxu1 }
0x3505   :  { %v2917_v40 = vadd.f32 %v2913_v59, %v2219_v58 }
0x3506   :  { %v3426_v56 = vpop.f32.mrf.mxu1 }
0x3507   :  { %3594 = vtanh.f32 %v2917_v40  ;;  %v2918_v30 = vmul.f32 0.5, %v2917_v40 }
0x3509   :  { %3596 = vtanh.f32 %v2918_v30 }
0x3514   :  { %v3595_v22 = vpop.eup %3594 }
0x3515   :  { %2925 = vrot.lane.b32.xlu1 %v3595_v22, %s3608_s30 }
0x3516   :  { %v3597_v50 = vpop.eup %3596 }
0x3517   :  { %v2920_v35 = vmul.f32 0.5, %v3597_v50 }
0x3519   :  { %v2921_v37 = vadd.f32 0.5, %v2920_v35 }
0x351b   :  { %v2923_v26 = vmul.f32 %v2921_v37, %v2831_v0 }
0x3587   :  { %v2926_v38 = vpop.permute.xlu1 %2925 }
0x3588   :  { %v2928_v54 = vmul.f32 %v2926_v38, %v2921_v37 }
0x358a   :  { %2930 = vrot.lane.b32.xlu0 %v2928_v54, %s3609_s4 }
0x35fc   :  { %v2931_v31 = vpop.permute.xlu0 %2930 }
0x35fd   :  { %v2933_v8 = vadd.f32 %v2931_v31, %v2923_v26 }
0x35ff   :  { %3598 = vtanh.f32 %v2933_v8 }
0x360c   :  { %v3599_v10 = vpop.eup %3598 }
0x360d   :  { %2936 = vrot.lane.b32.xlu1 %v3599_v10, %s3608_s30 }
0x367f   :  { %v2937_v4 = vpop.permute.xlu1 %2936 }
0x3680   :  { %v2939_v15 = vmul.f32 %v2937_v4, %v2921_v37 }
0x3682   :  { %2945 = vrot.lane.b32.xlu0 %v2939_v15, %s3609_s4 }
0x36f4   :  { %v2946_v11 = vpop.permute.xlu0 %2945 }
0x36f5   :  { %3436 = vmatmul.mubr.msk.f32.vlgmr.msra.gmra.mxu0 %vm197_vm3, %v2946_v11 }
0x37b5   :  { %v3015_v12 = vpop.f32.mrf.mxu0 }
0x37b6   :  { %v3019_v14 = vadd.f32 %v3015_v12, %v2224_v7 }
0x37b7   :  { %v3437_v51 = vpop.f32.mrf.mxu0 }
0x37b8   :  { %3600 = vtanh.f32 %v3019_v14  ;;  %v3020_v36 = vmul.f32 0.5, %v3019_v14 }
0x37ba   :  { %3602 = vtanh.f32 %v3020_v36 }
0x37c5   :  { %v3601_v53 = vpop.eup %3600 }
0x37c6   :  { %3027 = vrot.lane.b32.xlu1 %v3601_v53, %s3608_s30 }
0x37c7   :  { %v3603_v47 = vpop.eup %3602 }
0x37c8   :  { %v3022_v2 = vmul.f32 0.5, %v3603_v47 }
0x37ca   :  { %3044 = vrot.lane.b32.xlu1 %v4433_v52, %s3610_s10  ;;  %v3023_v41 = vadd.f32 0.5, %v3022_v2 }
0x37ce   :  { %2839 = vrot.lane.b32.xlu1 %v2837_v39, %s3608_s30 }
0x37d2   :  { %3048 = vrot.lane.b32.xlu1 %v3995_v62, %s3609_s4 }
0x37d6   :  { %2941 = vrot.lane.b32.xlu1 %v2939_v15, %s3610_s10 }
0x3838   :  { %v3028_v60 = vpop.permute.xlu1 %3027 }
0x3839   :  { %v3030_v3 = vmul.f32 %v3028_v60, %v3023_v41 }
0x383b   :  { %3032 = vrot.lane.b32.xlu0 %v3030_v3, %s3609_s4 }
0x383c   :  { %v3045_v23 = vpop.permute.xlu1 %3044 }
0x383d   :  { %v3054_v62 = vsel %vm197_vm3, %v4126_v29, %v3045_v23 }
0x383f   :  { %2433 = vrot.lane.b32.xlu0 %v4512_v57, %s3608_s30  ;;  %v3025_v57 = vmul.f32 %v3023_v41, %v2933_v8 }
0x3840   :  { %v2840_v52 = vpop.permute.xlu1 %2839 }
0x3841   :  { %2842 = vst.msk [vmem:[%s4655_s13 + $0x8] sm:$0xff] %vm2436_vm5, %v2840_v52 }
0x3843   :  { %2536 = vrot.lane.b32.xlu0 %v4531_v49, %s3610_s10 }
0x3844   :  { %v3049_v24 = vpop.permute.xlu1 %3048 }
0x3845   :  { %v3055_v42 = vsel %vm1307_vm4, %v3054_v62, %v3049_v24 }
0x3848   :  { %v2942_v13 = vpop.permute.xlu1 %2941 }
0x3849   :  { %2944 = vst.msk [vmem:[%s4655_s13 + $0x8] sm:$0xff] %vm2539_vm6, %v2942_v13 }
0x38ad   :  { %v3033_v55 = vpop.permute.xlu0 %3032 }
0x38ae   :  { %v3035_v21 = vadd.f32 %v3033_v55, %v3025_v57 }
0x38b0   :  { %3604 = vtanh.f32 %v3035_v21 }
0x38b1   :  { %v2434_v1 = vpop.permute.xlu0 %2433 }
0x38b2   :  { %2437 = vst.msk [vmem:[%s4655_s13] sm:$0xff] %vm2436_vm5, %v2434_v1 }
0x38b5   :  { %v2537_v29 = vpop.permute.xlu0 %2536 }
0x38b6   :  { %2540 = vst.msk [vmem:[%s4655_s13] sm:$0xff] %vm2539_vm6, %v2537_v29 }
0x38b7   :  { %2639 = vst.msk [vmem:[%s4655_s13] sm:$0xff] %vm2638_vm7, %v4551_v6 }
0x38bd   :  { %v3605_v49 = vpop.eup %3604 }
0x38be   :  { %3038 = vrot.lane.b32.xlu0 %v3605_v49, %s3608_s30 }
0x38c2   :  { %3051 = vrot.lane.b32.xlu0 %v4421_v44, %s3609_s4 }
0x3930   :  { %v3039_v28 = vpop.permute.xlu0 %3038 }
0x3931   :  { %v3041_v61 = vmul.f32 %v3039_v28, %v3023_v41 }
0x3933   :  { %3042 = vst.msk [vmem:[%s4655_s13 + $0x8] sm:$0xff] %vm2638_vm7, %v3041_v61 }
0x3934   :  { %v3052_v32 = vpop.permute.xlu0 %3051 }
0x3935   :  { %v3057_v43 = vsel %vm3056_vm8, %v3055_v42, %v3052_v32 }
0x3936   :  { %3058 = vst [vmem:[%s4656_s12] sm:$0xff] %v3057_v43 }

</bundles_post_ra>
